<compile_context>
chip_gen: v7x
topology: tpu7x:2x2x1
jax: 0.10.0
libtpu: 0.0.40
codegen_flags: <defaults>
</compile_context>

<pallas_src>
import functools

import jax
import jax.numpy as jnp
from jax.experimental import pallas as pl

LANE = 128


def _round_up(n, m):
    return ((n + m - 1) // m) * m


def _sigmoid(t):
    # Explicit exp-based sigmoid (same formula used in kernel and reference).
    return 1.0 / (1.0 + jnp.exp(-t))


def _ggnn_fwd_kernel(
    bbox_ref, c_ref,
    we_ref, be_ref,
    wi_phi_ref, wi_c_ref, bi_ref,
    wa_ref, ba_ref,
    wih_ref, whh_ref, bih_ref, bhh_ref,
    wo_h0_ref, wo_ht_ref, bo_ref,
    out_ref,
    *, max_steps, h_dim):
    f32 = jnp.float32

    # --- extractor: phi_o = bbox @ We + be   (nn.Linear(4, 16), lane-padded) ---
    phi_o = (jnp.dot(bbox_ref[...], we_ref[...], preferred_element_type=f32)
             + be_ref[...])

    # --- initializer: h_0 = tanh([phi_o, c] @ Wi + bi); the concat is done as
    #     a split matmul so everything stays lane-dense (no in-kernel concat) ---
    h_0 = jnp.tanh(
        jnp.dot(phi_o, wi_phi_ref[...], preferred_element_type=f32)
        + jnp.dot(c_ref[...], wi_c_ref[...], preferred_element_type=f32)
        + bi_ref[...])

    h = h_0
    for _ in range(max_steps):  # static unroll (max_steps == 3)
        # --- aggregator (AllLinearAggregator, eval-mode dropout = identity)
        #     x[v] = (sum_{v'} h[v'] - h[v]) @ Wa + (B-1)*ba   (ba pre-scaled) ---
        h_sum = jnp.sum(h, axis=0, keepdims=True)
        x = (jnp.dot(h_sum - h, wa_ref[...], preferred_element_type=f32)
             + ba_ref[...])

        # --- propagator: torch.nn.GRUCell(x_dim, h_dim) ---
        gi = jnp.dot(x, wih_ref[...], preferred_element_type=f32) + bih_ref[...]
        gh = jnp.dot(h, whh_ref[...], preferred_element_type=f32) + bhh_ref[...]
        i_r, i_z, i_n = gi[:, :h_dim], gi[:, h_dim:2 * h_dim], gi[:, 2 * h_dim:]
        h_r, h_z, h_n = gh[:, :h_dim], gh[:, h_dim:2 * h_dim], gh[:, 2 * h_dim:]
        r = _sigmoid(i_r + h_r)
        z = _sigmoid(i_z + h_z)
        n = jnp.tanh(i_n + r * h_n)
        h = (1.0 - z) * n + z * h

    # --- output head: logits = [h_0, h_T] @ Wo + bo  (split matmul, padded) ---
    out_ref[...] = (
        jnp.dot(h_0, wo_h0_ref[...], preferred_element_type=f32)
        + jnp.dot(h, wo_ht_ref[...], preferred_element_type=f32)
        + bo_ref[...]).astype(out_ref.dtype)


def prepare_kernel_params(p, batch, *, phi_dim=16, h_dim=128, num_tasks=6):
    """Transpose PyTorch-layout weights, fold constants, zero-pad to lane-dense
    (multiple-of-128) shapes.  Done once, outside the hot path."""
    def pad2(a, rows, cols):
        return jnp.pad(a, ((0, rows - a.shape[0]), (0, cols - a.shape[1])))

    t_pad = _round_up(num_tasks, LANE)
    return {
        "We": pad2(p["We"].T, LANE, LANE),                      # [4,16]  -> [128,128]
        "be": jnp.pad(p["be"], (0, LANE - phi_dim))[None, :],   # [16]    -> [1,128]
        "Wi_phi": pad2(p["Wi"][:, :phi_dim].T, LANE, h_dim),    # [16,h]  -> [128,h]
        "Wi_c": pad2(p["Wi"][:, phi_dim:].T, LANE, h_dim),      # [90,h]  -> [128,h]
        "bi": p["bi"][None, :],                                 # [1,h]
        "Wa": p["Wa"].T,                                        # [h,x]
        "ba_eff": ((batch - 1.0) * p["ba"])[None, :],           # (B-1)*ba  [1,x]
        "Wih": p["Wih"].T,                                      # [x,3h]
        "Whh": p["Whh"].T,                                      # [h,3h]
        "bih": p["bih"][None, :],                               # [1,3h]
        "bhh": p["bhh"][None, :],                               # [1,3h]
        "Wo_h0": pad2(p["Wo"][:, :h_dim].T, h_dim, t_pad),      # [h,T]   -> [h,Tp]
        "Wo_hT": pad2(p["Wo"][:, h_dim:].T, h_dim, t_pad),      # [h,T]   -> [h,Tp]
        "bo": jnp.pad(p["bo"], (0, t_pad - num_tasks))[None, :],
    }


def ggnn_bbox_noimg_forward(bbox, c, d, kp, *, max_steps=3, h_dim=128,
                            num_tasks=6):
    del d  # unused by AllLinearAggregator (kept for signature parity)
    batch = bbox.shape[0]
    bbox_p = jnp.pad(bbox, ((0, 0), (0, LANE - bbox.shape[1])))
    c_p = jnp.pad(c, ((0, 0), (0, LANE - c.shape[1])))

    operands = (
        bbox_p, c_p,
        kp["We"], kp["be"],
        kp["Wi_phi"], kp["Wi_c"], kp["bi"],
        kp["Wa"], kp["ba_eff"],
        kp["Wih"], kp["Whh"], kp["bih"], kp["bhh"],
        kp["Wo_h0"], kp["Wo_hT"], kp["bo"],
    )
    t_pad = kp["bo"].shape[1]

    out_padded = pl.pallas_call(
        functools.partial(_ggnn_fwd_kernel, max_steps=max_steps, h_dim=h_dim),
        out_shape=jax.ShapeDtypeStruct((batch, t_pad), jnp.float32),
        in_specs=[pl.BlockSpec(op.shape, lambda: (0, 0)) for op in operands],
        out_specs=pl.BlockSpec((batch, t_pad), lambda: (0, 0)),
    )(*operands)
    return out_padded[:, :num_tasks]


def _reference_forward(bbox, c, d, p, *, max_steps=3):
    """Pure-JAX reference following the PyTorch math exactly (unpadded params)."""
    del d
    hi = jax.lax.Precision.HIGHEST
    phi_o = jnp.dot(bbox, p["We"].T, precision=hi) + p["be"]
    h_0 = jnp.tanh(jnp.dot(jnp.concatenate([phi_o, c], axis=1), p["Wi"].T,
                           precision=hi) + p["bi"])
    h = h_0
    hd = p["bi"].shape[0]
    for _ in range(max_steps):
        y = jnp.dot(h, p["Wa"].T, precision=hi) + p["ba"]
        x = jnp.sum(y, axis=0, keepdims=True) - y
        gi = jnp.dot(x, p["Wih"].T, precision=hi) + p["bih"]
        gh = jnp.dot(h, p["Whh"].T, precision=hi) + p["bhh"]
        i_r, i_z, i_n = gi[:, :hd], gi[:, hd:2 * hd], gi[:, 2 * hd:]
        h_r, h_z, h_n = gh[:, :hd], gh[:, hd:2 * hd], gh[:, 2 * hd:]
        r = _sigmoid(i_r + h_r)
        z = _sigmoid(i_z + h_z)
        n = jnp.tanh(i_n + r * h_n)
        h = (1.0 - z) * n + z * h
    return jnp.dot(jnp.concatenate([h_0, h], axis=1), p["Wo"].T,
                   precision=hi) + p["bo"]


if __name__ == "__main__":
    B, bbox_dim, phi_dim, class_dim = 8, 4, 16, 90
    h_dim = x_dim = 128
    num_tasks, max_steps = 6, 3

    key = jax.random.PRNGKey(0)
    ks = jax.random.split(key, 16)

    def uni(k, shape, fan_in):
        b = 1.0 / (fan_in ** 0.5)
        return jax.random.uniform(k, shape, minval=-b, maxval=b,
                                  dtype=jnp.float32)

    # inputs (normalized bbox, one-hot class, detection score)
    bbox = jax.random.uniform(ks[0], (B, bbox_dim), dtype=jnp.float32)
    cls = jax.random.randint(ks[1], (B,), 0, class_dim)
    c = jax.nn.one_hot(cls, class_dim, dtype=jnp.float32)
    d = jax.random.uniform(ks[2], (B, 1), dtype=jnp.float32)

    # parameters in PyTorch layout ([out, in] weights, [r|z|n]-stacked GRU gates)
    params = {
        "We": uni(ks[3], (phi_dim, bbox_dim), bbox_dim),
        "be": uni(ks[4], (phi_dim,), bbox_dim),
        "Wi": uni(ks[5], (h_dim, phi_dim + class_dim), phi_dim + class_dim),
        "bi": uni(ks[6], (h_dim,), phi_dim + class_dim),
        "Wa": uni(ks[7], (x_dim, h_dim), h_dim),
        "ba": uni(ks[8], (x_dim,), h_dim),
        "Wih": uni(ks[9], (3 * h_dim, x_dim), h_dim),
        "bih": uni(ks[10], (3 * h_dim,), h_dim),
        "Whh": uni(ks[11], (3 * h_dim, h_dim), h_dim),
        "bhh": uni(ks[12], (3 * h_dim,), h_dim),
        "Wo": uni(ks[13], (num_tasks, 2 * h_dim), 2 * h_dim),
        "bo": uni(ks[14], (num_tasks,), 2 * h_dim),
    }

    kparams = prepare_kernel_params(params, B, phi_dim=phi_dim, h_dim=h_dim,
                                    num_tasks=num_tasks)

    out = ggnn_bbox_noimg_forward(bbox, c, d, kparams, max_steps=max_steps,
                                  h_dim=h_dim, num_tasks=num_tasks)
    out = jax.block_until_ready(out)

    ref = _reference_forward(bbox, c, d, params, max_steps=max_steps)
    assert out.shape == (B, num_tasks)
    # The algebraic aggregator rewrite, split matmuls and lane padding
    # reassociate f32 sums (~1e-6 level); 1e-3 is comfortably above that and
    # far below any real bug (logits are O(1)).
    assert jnp.allclose(out, ref, atol=1e-3, rtol=1e-3), "mismatch vs reference"

    print("KERNEL_OK")
</pallas_src>

<mosaic_0001>
module attributes {stable_mosaic.version = 11 : i64} {
  func.func @_ggnn_fwd_kernel(%arg0: memref<8x128xf32, #tpu.memory_space<vmem>>, %arg1: memref<8x128xf32, #tpu.memory_space<vmem>>, %arg2: memref<128x128xf32, #tpu.memory_space<vmem>>, %arg3: memref<1x128xf32, #tpu.memory_space<vmem>>, %arg4: memref<128x128xf32, #tpu.memory_space<vmem>>, %arg5: memref<128x128xf32, #tpu.memory_space<vmem>>, %arg6: memref<1x128xf32, #tpu.memory_space<vmem>>, %arg7: memref<128x128xf32, #tpu.memory_space<vmem>>, %arg8: memref<1x128xf32, #tpu.memory_space<vmem>>, %arg9: memref<128x384xf32, #tpu.memory_space<vmem>>, %arg10: memref<128x384xf32, #tpu.memory_space<vmem>>, %arg11: memref<1x384xf32, #tpu.memory_space<vmem>>, %arg12: memref<1x384xf32, #tpu.memory_space<vmem>>, %arg13: memref<128x128xf32, #tpu.memory_space<vmem>>, %arg14: memref<128x128xf32, #tpu.memory_space<vmem>>, %arg15: memref<1x128xf32, #tpu.memory_space<vmem>>, %arg16: memref<8x128xf32, #tpu.memory_space<vmem>>) attributes {dimension_semantics = [], scalar_prefetch = 0 : i64, scratch_operands = 0 : i64, tpu.core_type = #tpu.core_type<tc>} {
    %c0 = arith.constant 0 : index
    %c0_0 = arith.constant 0 : index
    %0 = vector.load %arg0[%c0, %c0_0] : memref<8x128xf32, #tpu.memory_space<vmem>>, vector<8x128xf32>
    %c0_1 = arith.constant 0 : index
    %c0_2 = arith.constant 0 : index
    %1 = vector.load %arg2[%c0_1, %c0_2] : memref<128x128xf32, #tpu.memory_space<vmem>>, vector<128x128xf32>
    %cst = arith.constant dense<0.000000e+00> : vector<8x128xf32>
    %2 = tpu.matmul %0, %1, %cst {dimension_numbers = #tpu.dot_dimension_numbers<[1], [0], [0], [1], [0, 0, 1, 1], [], []>} : vector<8x128xf32>, vector<128x128xf32>, vector<8x128xf32> -> vector<8x128xf32>
    %c0_3 = arith.constant 0 : index
    %c0_4 = arith.constant 0 : index
    %3 = vector.load %arg3[%c0_3, %c0_4] : memref<1x128xf32, #tpu.memory_space<vmem>>, vector<1x128xf32>
    %4 = vector.broadcast %3 : vector<1x128xf32> to vector<8x128xf32>
    %5 = arith.addf %2, %4 : vector<8x128xf32>
    %c0_5 = arith.constant 0 : index
    %c0_6 = arith.constant 0 : index
    %6 = vector.load %arg4[%c0_5, %c0_6] : memref<128x128xf32, #tpu.memory_space<vmem>>, vector<128x128xf32>
    %cst_7 = arith.constant dense<0.000000e+00> : vector<8x128xf32>
    %7 = tpu.matmul %5, %6, %cst_7 {dimension_numbers = #tpu.dot_dimension_numbers<[1], [0], [0], [1], [0, 0, 1, 1], [], []>} : vector<8x128xf32>, vector<128x128xf32>, vector<8x128xf32> -> vector<8x128xf32>
    %c0_8 = arith.constant 0 : index
    %c0_9 = arith.constant 0 : index
    %8 = vector.load %arg1[%c0_8, %c0_9] : memref<8x128xf32, #tpu.memory_space<vmem>>, vector<8x128xf32>
    %c0_10 = arith.constant 0 : index
    %c0_11 = arith.constant 0 : index
    %9 = vector.load %arg5[%c0_10, %c0_11] : memref<128x128xf32, #tpu.memory_space<vmem>>, vector<128x128xf32>
    %cst_12 = arith.constant dense<0.000000e+00> : vector<8x128xf32>
    %10 = tpu.matmul %8, %9, %cst_12 {dimension_numbers = #tpu.dot_dimension_numbers<[1], [0], [0], [1], [0, 0, 1, 1], [], []>} : vector<8x128xf32>, vector<128x128xf32>, vector<8x128xf32> -> vector<8x128xf32>
    %11 = arith.addf %7, %10 : vector<8x128xf32>
    %c0_13 = arith.constant 0 : index
    %c0_14 = arith.constant 0 : index
    %12 = vector.load %arg6[%c0_13, %c0_14] : memref<1x128xf32, #tpu.memory_space<vmem>>, vector<1x128xf32>
    %13 = vector.broadcast %12 : vector<1x128xf32> to vector<8x128xf32>
    %14 = arith.addf %11, %13 : vector<8x128xf32>
    %15 = math.tanh %14 : vector<8x128xf32>
    %cst_15 = arith.constant dense<0.000000e+00> : vector<128xf32>
    %16 = vector.multi_reduction <add>, %15, %cst_15 [0] : vector<8x128xf32> to vector<128xf32>
    %17 = vector.shape_cast %16 : vector<128xf32> to vector<1x128xf32>
    %18 = vector.broadcast %17 : vector<1x128xf32> to vector<8x128xf32>
    %19 = arith.subf %18, %15 : vector<8x128xf32>
    %c0_16 = arith.constant 0 : index
    %c0_17 = arith.constant 0 : index
    %20 = vector.load %arg7[%c0_16, %c0_17] : memref<128x128xf32, #tpu.memory_space<vmem>>, vector<128x128xf32>
    %cst_18 = arith.constant dense<0.000000e+00> : vector<8x128xf32>
    %21 = tpu.matmul %19, %20, %cst_18 {dimension_numbers = #tpu.dot_dimension_numbers<[1], [0], [0], [1], [0, 0, 1, 1], [], []>} : vector<8x128xf32>, vector<128x128xf32>, vector<8x128xf32> -> vector<8x128xf32>
    %c0_19 = arith.constant 0 : index
    %c0_20 = arith.constant 0 : index
    %22 = vector.load %arg8[%c0_19, %c0_20] : memref<1x128xf32, #tpu.memory_space<vmem>>, vector<1x128xf32>
    %23 = vector.broadcast %22 : vector<1x128xf32> to vector<8x128xf32>
    %24 = arith.addf %21, %23 : vector<8x128xf32>
    %c0_21 = arith.constant 0 : index
    %c0_22 = arith.constant 0 : index
    %25 = vector.load %arg9[%c0_21, %c0_22] : memref<128x384xf32, #tpu.memory_space<vmem>>, vector<128x384xf32>
    %cst_23 = arith.constant dense<0.000000e+00> : vector<8x384xf32>
    %26 = tpu.matmul %24, %25, %cst_23 {dimension_numbers = #tpu.dot_dimension_numbers<[1], [0], [0], [1], [0, 0, 1, 1], [], []>} : vector<8x128xf32>, vector<128x384xf32>, vector<8x384xf32> -> vector<8x384xf32>
    %c0_24 = arith.constant 0 : index
    %c0_25 = arith.constant 0 : index
    %27 = vector.load %arg11[%c0_24, %c0_25] : memref<1x384xf32, #tpu.memory_space<vmem>>, vector<1x384xf32>
    %28 = vector.broadcast %27 : vector<1x384xf32> to vector<8x384xf32>
    %29 = arith.addf %26, %28 : vector<8x384xf32>
    %c0_26 = arith.constant 0 : index
    %c0_27 = arith.constant 0 : index
    %30 = vector.load %arg10[%c0_26, %c0_27] : memref<128x384xf32, #tpu.memory_space<vmem>>, vector<128x384xf32>
    %cst_28 = arith.constant dense<0.000000e+00> : vector<8x384xf32>
    %31 = tpu.matmul %15, %30, %cst_28 {dimension_numbers = #tpu.dot_dimension_numbers<[1], [0], [0], [1], [0, 0, 1, 1], [], []>} : vector<8x128xf32>, vector<128x384xf32>, vector<8x384xf32> -> vector<8x384xf32>
    %c0_29 = arith.constant 0 : index
    %c0_30 = arith.constant 0 : index
    %32 = vector.load %arg12[%c0_29, %c0_30] : memref<1x384xf32, #tpu.memory_space<vmem>>, vector<1x384xf32>
    %33 = vector.broadcast %32 : vector<1x384xf32> to vector<8x384xf32>
    %34 = arith.addf %31, %33 : vector<8x384xf32>
    %35 = vector.extract_strided_slice %29 {offsets = [0, 0], sizes = [8, 128], strides = [1, 1]} : vector<8x384xf32> to vector<8x128xf32>
    %36 = vector.extract_strided_slice %29 {offsets = [0, 128], sizes = [8, 128], strides = [1, 1]} : vector<8x384xf32> to vector<8x128xf32>
    %37 = vector.extract_strided_slice %29 {offsets = [0, 256], sizes = [8, 128], strides = [1, 1]} : vector<8x384xf32> to vector<8x128xf32>
    %38 = vector.extract_strided_slice %34 {offsets = [0, 0], sizes = [8, 128], strides = [1, 1]} : vector<8x384xf32> to vector<8x128xf32>
    %39 = vector.extract_strided_slice %34 {offsets = [0, 128], sizes = [8, 128], strides = [1, 1]} : vector<8x384xf32> to vector<8x128xf32>
    %40 = vector.extract_strided_slice %34 {offsets = [0, 256], sizes = [8, 128], strides = [1, 1]} : vector<8x384xf32> to vector<8x128xf32>
    %41 = arith.addf %35, %38 : vector<8x128xf32>
    %cst_31 = arith.constant 0.000000e+00 : f32
    %42 = vector.broadcast %cst_31 : f32 to vector<8x128xf32>
    %43 = arith.subf %42, %41 : vector<8x128xf32>
    %44 = math.exp %43 : vector<8x128xf32>
    %cst_32 = arith.constant 1.000000e+00 : f32
    %45 = vector.broadcast %cst_32 : f32 to vector<8x128xf32>
    %46 = arith.addf %45, %44 : vector<8x128xf32>
    %cst_33 = arith.constant 1.000000e+00 : f32
    %47 = vector.broadcast %cst_33 : f32 to vector<8x128xf32>
    %48 = arith.divf %47, %46 : vector<8x128xf32>
    %49 = arith.addf %36, %39 : vector<8x128xf32>
    %cst_34 = arith.constant 0.000000e+00 : f32
    %50 = vector.broadcast %cst_34 : f32 to vector<8x128xf32>
    %51 = arith.subf %50, %49 : vector<8x128xf32>
    %52 = math.exp %51 : vector<8x128xf32>
    %cst_35 = arith.constant 1.000000e+00 : f32
    %53 = vector.broadcast %cst_35 : f32 to vector<8x128xf32>
    %54 = arith.addf %53, %52 : vector<8x128xf32>
    %cst_36 = arith.constant 1.000000e+00 : f32
    %55 = vector.broadcast %cst_36 : f32 to vector<8x128xf32>
    %56 = arith.divf %55, %54 : vector<8x128xf32>
    %57 = arith.mulf %48, %40 : vector<8x128xf32>
    %58 = arith.addf %37, %57 : vector<8x128xf32>
    %59 = math.tanh %58 : vector<8x128xf32>
    %cst_37 = arith.constant 1.000000e+00 : f32
    %60 = vector.broadcast %cst_37 : f32 to vector<8x128xf32>
    %61 = arith.subf %60, %56 : vector<8x128xf32>
    %62 = arith.mulf %61, %59 : vector<8x128xf32>
    %63 = arith.mulf %56, %15 : vector<8x128xf32>
    %64 = arith.addf %62, %63 : vector<8x128xf32>
    %cst_38 = arith.constant dense<0.000000e+00> : vector<128xf32>
    %65 = vector.multi_reduction <add>, %64, %cst_38 [0] : vector<8x128xf32> to vector<128xf32>
    %66 = vector.shape_cast %65 : vector<128xf32> to vector<1x128xf32>
    %67 = vector.broadcast %66 : vector<1x128xf32> to vector<8x128xf32>
    %68 = arith.subf %67, %64 : vector<8x128xf32>
    %c0_39 = arith.constant 0 : index
    %c0_40 = arith.constant 0 : index
    %69 = vector.load %arg7[%c0_39, %c0_40] : memref<128x128xf32, #tpu.memory_space<vmem>>, vector<128x128xf32>
    %cst_41 = arith.constant dense<0.000000e+00> : vector<8x128xf32>
    %70 = tpu.matmul %68, %69, %cst_41 {dimension_numbers = #tpu.dot_dimension_numbers<[1], [0], [0], [1], [0, 0, 1, 1], [], []>} : vector<8x128xf32>, vector<128x128xf32>, vector<8x128xf32> -> vector<8x128xf32>
    %c0_42 = arith.constant 0 : index
    %c0_43 = arith.constant 0 : index
    %71 = vector.load %arg8[%c0_42, %c0_43] : memref<1x128xf32, #tpu.memory_space<vmem>>, vector<1x128xf32>
    %72 = vector.broadcast %71 : vector<1x128xf32> to vector<8x128xf32>
    %73 = arith.addf %70, %72 : vector<8x128xf32>
    %c0_44 = arith.constant 0 : index
    %c0_45 = arith.constant 0 : index
    %74 = vector.load %arg9[%c0_44, %c0_45] : memref<128x384xf32, #tpu.memory_space<vmem>>, vector<128x384xf32>
    %cst_46 = arith.constant dense<0.000000e+00> : vector<8x384xf32>
    %75 = tpu.matmul %73, %74, %cst_46 {dimension_numbers = #tpu.dot_dimension_numbers<[1], [0], [0], [1], [0, 0, 1, 1], [], []>} : vector<8x128xf32>, vector<128x384xf32>, vector<8x384xf32> -> vector<8x384xf32>
    %c0_47 = arith.constant 0 : index
    %c0_48 = arith.constant 0 : index
    %76 = vector.load %arg11[%c0_47, %c0_48] : memref<1x384xf32, #tpu.memory_space<vmem>>, vector<1x384xf32>
    %77 = vector.broadcast %76 : vector<1x384xf32> to vector<8x384xf32>
    %78 = arith.addf %75, %77 : vector<8x384xf32>
    %c0_49 = arith.constant 0 : index
    %c0_50 = arith.constant 0 : index
    %79 = vector.load %arg10[%c0_49, %c0_50] : memref<128x384xf32, #tpu.memory_space<vmem>>, vector<128x384xf32>
    %cst_51 = arith.constant dense<0.000000e+00> : vector<8x384xf32>
    %80 = tpu.matmul %64, %79, %cst_51 {dimension_numbers = #tpu.dot_dimension_numbers<[1], [0], [0], [1], [0, 0, 1, 1], [], []>} : vector<8x128xf32>, vector<128x384xf32>, vector<8x384xf32> -> vector<8x384xf32>
    %c0_52 = arith.constant 0 : index
    %c0_53 = arith.constant 0 : index
    %81 = vector.load %arg12[%c0_52, %c0_53] : memref<1x384xf32, #tpu.memory_space<vmem>>, vector<1x384xf32>
    %82 = vector.broadcast %81 : vector<1x384xf32> to vector<8x384xf32>
    %83 = arith.addf %80, %82 : vector<8x384xf32>
    %84 = vector.extract_strided_slice %78 {offsets = [0, 0], sizes = [8, 128], strides = [1, 1]} : vector<8x384xf32> to vector<8x128xf32>
    %85 = vector.extract_strided_slice %78 {offsets = [0, 128], sizes = [8, 128], strides = [1, 1]} : vector<8x384xf32> to vector<8x128xf32>
    %86 = vector.extract_strided_slice %78 {offsets = [0, 256], sizes = [8, 128], strides = [1, 1]} : vector<8x384xf32> to vector<8x128xf32>
    %87 = vector.extract_strided_slice %83 {offsets = [0, 0], sizes = [8, 128], strides = [1, 1]} : vector<8x384xf32> to vector<8x128xf32>
    %88 = vector.extract_strided_slice %83 {offsets = [0, 128], sizes = [8, 128], strides = [1, 1]} : vector<8x384xf32> to vector<8x128xf32>
    %89 = vector.extract_strided_slice %83 {offsets = [0, 256], sizes = [8, 128], strides = [1, 1]} : vector<8x384xf32> to vector<8x128xf32>
    %90 = arith.addf %84, %87 : vector<8x128xf32>
    %cst_54 = arith.constant 0.000000e+00 : f32
    %91 = vector.broadcast %cst_54 : f32 to vector<8x128xf32>
    %92 = arith.subf %91, %90 : vector<8x128xf32>
    %93 = math.exp %92 : vector<8x128xf32>
    %cst_55 = arith.constant 1.000000e+00 : f32
    %94 = vector.broadcast %cst_55 : f32 to vector<8x128xf32>
    %95 = arith.addf %94, %93 : vector<8x128xf32>
    %cst_56 = arith.constant 1.000000e+00 : f32
    %96 = vector.broadcast %cst_56 : f32 to vector<8x128xf32>
    %97 = arith.divf %96, %95 : vector<8x128xf32>
    %98 = arith.addf %85, %88 : vector<8x128xf32>
    %cst_57 = arith.constant 0.000000e+00 : f32
    %99 = vector.broadcast %cst_57 : f32 to vector<8x128xf32>
    %100 = arith.subf %99, %98 : vector<8x128xf32>
    %101 = math.exp %100 : vector<8x128xf32>
    %cst_58 = arith.constant 1.000000e+00 : f32
    %102 = vector.broadcast %cst_58 : f32 to vector<8x128xf32>
    %103 = arith.addf %102, %101 : vector<8x128xf32>
    %cst_59 = arith.constant 1.000000e+00 : f32
    %104 = vector.broadcast %cst_59 : f32 to vector<8x128xf32>
    %105 = arith.divf %104, %103 : vector<8x128xf32>
    %106 = arith.mulf %97, %89 : vector<8x128xf32>
    %107 = arith.addf %86, %106 : vector<8x128xf32>
    %108 = math.tanh %107 : vector<8x128xf32>
    %cst_60 = arith.constant 1.000000e+00 : f32
    %109 = vector.broadcast %cst_60 : f32 to vector<8x128xf32>
    %110 = arith.subf %109, %105 : vector<8x128xf32>
    %111 = arith.mulf %110, %108 : vector<8x128xf32>
    %112 = arith.mulf %105, %64 : vector<8x128xf32>
    %113 = arith.addf %111, %112 : vector<8x128xf32>
    %cst_61 = arith.constant dense<0.000000e+00> : vector<128xf32>
    %114 = vector.multi_reduction <add>, %113, %cst_61 [0] : vector<8x128xf32> to vector<128xf32>
    %115 = vector.shape_cast %114 : vector<128xf32> to vector<1x128xf32>
    %116 = vector.broadcast %115 : vector<1x128xf32> to vector<8x128xf32>
    %117 = arith.subf %116, %113 : vector<8x128xf32>
    %c0_62 = arith.constant 0 : index
    %c0_63 = arith.constant 0 : index
    %118 = vector.load %arg7[%c0_62, %c0_63] : memref<128x128xf32, #tpu.memory_space<vmem>>, vector<128x128xf32>
    %cst_64 = arith.constant dense<0.000000e+00> : vector<8x128xf32>
    %119 = tpu.matmul %117, %118, %cst_64 {dimension_numbers = #tpu.dot_dimension_numbers<[1], [0], [0], [1], [0, 0, 1, 1], [], []>} : vector<8x128xf32>, vector<128x128xf32>, vector<8x128xf32> -> vector<8x128xf32>
    %c0_65 = arith.constant 0 : index
    %c0_66 = arith.constant 0 : index
    %120 = vector.load %arg8[%c0_65, %c0_66] : memref<1x128xf32, #tpu.memory_space<vmem>>, vector<1x128xf32>
    %121 = vector.broadcast %120 : vector<1x128xf32> to vector<8x128xf32>
    %122 = arith.addf %119, %121 : vector<8x128xf32>
    %c0_67 = arith.constant 0 : index
    %c0_68 = arith.constant 0 : index
    %123 = vector.load %arg9[%c0_67, %c0_68] : memref<128x384xf32, #tpu.memory_space<vmem>>, vector<128x384xf32>
    %cst_69 = arith.constant dense<0.000000e+00> : vector<8x384xf32>
    %124 = tpu.matmul %122, %123, %cst_69 {dimension_numbers = #tpu.dot_dimension_numbers<[1], [0], [0], [1], [0, 0, 1, 1], [], []>} : vector<8x128xf32>, vector<128x384xf32>, vector<8x384xf32> -> vector<8x384xf32>
    %c0_70 = arith.constant 0 : index
    %c0_71 = arith.constant 0 : index
    %125 = vector.load %arg11[%c0_70, %c0_71] : memref<1x384xf32, #tpu.memory_space<vmem>>, vector<1x384xf32>
    %126 = vector.broadcast %125 : vector<1x384xf32> to vector<8x384xf32>
    %127 = arith.addf %124, %126 : vector<8x384xf32>
    %c0_72 = arith.constant 0 : index
    %c0_73 = arith.constant 0 : index
    %128 = vector.load %arg10[%c0_72, %c0_73] : memref<128x384xf32, #tpu.memory_space<vmem>>, vector<128x384xf32>
    %cst_74 = arith.constant dense<0.000000e+00> : vector<8x384xf32>
    %129 = tpu.matmul %113, %128, %cst_74 {dimension_numbers = #tpu.dot_dimension_numbers<[1], [0], [0], [1], [0, 0, 1, 1], [], []>} : vector<8x128xf32>, vector<128x384xf32>, vector<8x384xf32> -> vector<8x384xf32>
    %c0_75 = arith.constant 0 : index
    %c0_76 = arith.constant 0 : index
    %130 = vector.load %arg12[%c0_75, %c0_76] : memref<1x384xf32, #tpu.memory_space<vmem>>, vector<1x384xf32>
    %131 = vector.broadcast %130 : vector<1x384xf32> to vector<8x384xf32>
    %132 = arith.addf %129, %131 : vector<8x384xf32>
    %133 = vector.extract_strided_slice %127 {offsets = [0, 0], sizes = [8, 128], strides = [1, 1]} : vector<8x384xf32> to vector<8x128xf32>
    %134 = vector.extract_strided_slice %127 {offsets = [0, 128], sizes = [8, 128], strides = [1, 1]} : vector<8x384xf32> to vector<8x128xf32>
    %135 = vector.extract_strided_slice %127 {offsets = [0, 256], sizes = [8, 128], strides = [1, 1]} : vector<8x384xf32> to vector<8x128xf32>
    %136 = vector.extract_strided_slice %132 {offsets = [0, 0], sizes = [8, 128], strides = [1, 1]} : vector<8x384xf32> to vector<8x128xf32>
    %137 = vector.extract_strided_slice %132 {offsets = [0, 128], sizes = [8, 128], strides = [1, 1]} : vector<8x384xf32> to vector<8x128xf32>
    %138 = vector.extract_strided_slice %132 {offsets = [0, 256], sizes = [8, 128], strides = [1, 1]} : vector<8x384xf32> to vector<8x128xf32>
    %139 = arith.addf %133, %136 : vector<8x128xf32>
    %cst_77 = arith.constant 0.000000e+00 : f32
    %140 = vector.broadcast %cst_77 : f32 to vector<8x128xf32>
    %141 = arith.subf %140, %139 : vector<8x128xf32>
    %142 = math.exp %141 : vector<8x128xf32>
    %cst_78 = arith.constant 1.000000e+00 : f32
    %143 = vector.broadcast %cst_78 : f32 to vector<8x128xf32>
    %144 = arith.addf %143, %142 : vector<8x128xf32>
    %cst_79 = arith.constant 1.000000e+00 : f32
    %145 = vector.broadcast %cst_79 : f32 to vector<8x128xf32>
    %146 = arith.divf %145, %144 : vector<8x128xf32>
    %147 = arith.addf %134, %137 : vector<8x128xf32>
    %cst_80 = arith.constant 0.000000e+00 : f32
    %148 = vector.broadcast %cst_80 : f32 to vector<8x128xf32>
    %149 = arith.subf %148, %147 : vector<8x128xf32>
    %150 = math.exp %149 : vector<8x128xf32>
    %cst_81 = arith.constant 1.000000e+00 : f32
    %151 = vector.broadcast %cst_81 : f32 to vector<8x128xf32>
    %152 = arith.addf %151, %150 : vector<8x128xf32>
    %cst_82 = arith.constant 1.000000e+00 : f32
    %153 = vector.broadcast %cst_82 : f32 to vector<8x128xf32>
    %154 = arith.divf %153, %152 : vector<8x128xf32>
    %155 = arith.mulf %146, %138 : vector<8x128xf32>
    %156 = arith.addf %135, %155 : vector<8x128xf32>
    %157 = math.tanh %156 : vector<8x128xf32>
    %cst_83 = arith.constant 1.000000e+00 : f32
    %158 = vector.broadcast %cst_83 : f32 to vector<8x128xf32>
    %159 = arith.subf %158, %154 : vector<8x128xf32>
    %160 = arith.mulf %159, %157 : vector<8x128xf32>
    %161 = arith.mulf %154, %113 : vector<8x128xf32>
    %162 = arith.addf %160, %161 : vector<8x128xf32>
    %c0_84 = arith.constant 0 : index
    %c0_85 = arith.constant 0 : index
    %163 = vector.load %arg13[%c0_84, %c0_85] : memref<128x128xf32, #tpu.memory_space<vmem>>, vector<128x128xf32>
    %cst_86 = arith.constant dense<0.000000e+00> : vector<8x128xf32>
    %164 = tpu.matmul %15, %163, %cst_86 {dimension_numbers = #tpu.dot_dimension_numbers<[1], [0], [0], [1], [0, 0, 1, 1], [], []>} : vector<8x128xf32>, vector<128x128xf32>, vector<8x128xf32> -> vector<8x128xf32>
    %c0_87 = arith.constant 0 : index
    %c0_88 = arith.constant 0 : index
    %165 = vector.load %arg14[%c0_87, %c0_88] : memref<128x128xf32, #tpu.memory_space<vmem>>, vector<128x128xf32>
    %cst_89 = arith.constant dense<0.000000e+00> : vector<8x128xf32>
    %166 = tpu.matmul %162, %165, %cst_89 {dimension_numbers = #tpu.dot_dimension_numbers<[1], [0], [0], [1], [0, 0, 1, 1], [], []>} : vector<8x128xf32>, vector<128x128xf32>, vector<8x128xf32> -> vector<8x128xf32>
    %167 = arith.addf %164, %166 : vector<8x128xf32>
    %c0_90 = arith.constant 0 : index
    %c0_91 = arith.constant 0 : index
    %168 = vector.load %arg15[%c0_90, %c0_91] : memref<1x128xf32, #tpu.memory_space<vmem>>, vector<1x128xf32>
    %169 = vector.broadcast %168 : vector<1x128xf32> to vector<8x128xf32>
    %170 = arith.addf %167, %169 : vector<8x128xf32>
    %c0_92 = arith.constant 0 : index
    %c0_93 = arith.constant 0 : index
    %171 = vector.load %arg16[%c0_92, %c0_93] : memref<8x128xf32, #tpu.memory_space<vmem>>, vector<8x128xf32>
    tpu.vector_store %arg16[%c0_92, %c0_93], %170 {strides = array<i32>} : memref<8x128xf32, #tpu.memory_space<vmem>>, vector<8x128xf32>,
    return
  }
}

</mosaic_0001>

<bundles_post_ra>
// kernel: tpu_custom_call.1
= control target key start
LH: loop header
LB: loop body
LE: loop exit
PB: predicated region body
PF: predicated region fallthrough
CT: control target
= control target key end

     0   :  { %s4296_s0 = inlined_call_operand.hbm [shape: f32[8,128], index: 0, kind: input, shape index: {}]   ;;  %s4297_s1 = inlined_call_operand.hbm [shape: f32[8,128], index: 1, kind: input, shape index: {}]   ;;  %s4298_s2 = inlined_call_operand.hbm [shape: f32[128,128], index: 2, kind: input, shape index: {}]   ;;  %s4299_s3 = inlined_call_operand.vmem [shape: f32[1,128], index: 3, kind: input, shape index: {}]   ;;  %s4300_s4 = inlined_call_operand.hbm [shape: f32[128,128], index: 4, kind: input, shape index: {}]   ;;  %s4301_s5 = inlined_call_operand.hbm [shape: f32[128,128], index: 5, kind: input, shape index: {}]   ;;  %s4302_s6 = inlined_call_operand.vmem [shape: f32[1,128], index: 6, kind: input, shape index: {}]   ;;  %s4303_s7 = inlined_call_operand.hbm [shape: f32[128,128], index: 7, kind: input, shape index: {}]   ;;  %s4304_s8 = inlined_call_operand.vmem [shape: f32[1,128], index: 8, kind: input, shape index: {}]   ;;  %s4305_s9 = inlined_call_operand.hbm [shape: f32[128,384], index: 9, kind: input, shape index: {}]   ;;  %s4306_s10 = inlined_call_operand.hbm [shape: f32[128,384], index: 10, kind: input, shape index: {}]   ;;  %s4307_s11 = inlined_call_operand.vmem [shape: f32[1,384], index: 11, kind: input, shape index: {}]   ;;  %s4308_s12 = inlined_call_operand.vmem [shape: f32[1,384], index: 12, kind: input, shape index: {}]   ;;  %s4309_s13 = inlined_call_operand.hbm [shape: f32[128,128], index: 13, kind: input, shape index: {}]   ;;  %s4310_s14 = inlined_call_operand.hbm [shape: f32[128,128], index: 14, kind: input, shape index: {}]   ;;  %s4311_s15 = inlined_call_operand.vmem [shape: f32[1,128], index: 15, kind: input, shape index: {}]   ;;  %s4312_s16 = inlined_call_operand.hbm [shape: f32[8,128], index: 16, kind: output, shape index: {}]  }
   0x1   :  { %4341 = sst [smem:[#allocation45_spill]] %s4296_s0 }
   0x2   :  { %21 = vsyncpa [#allocation3], 0 }
   0x3   :  { %22 = vsyncpa [#allocation6], 0 }
   0x4   :  { %23 = vsyncpa [#allocation9], 0 }
   0x5   :  { %24 = vsyncpa [#allocation12], 0 }
   0x6   :  { %25 = vsyncpa [#allocation15], 0 }
   0x7   :  { %26 = vsyncpa [#allocation18], 0 }
   0x8   :  { %27 = vsyncpa [#allocation4], 0  ;;  %s3540_s21 = smov [#allocation5]   ;;  %s3284_s25 = scalar_lea.hbm %s4297_s1, 128 }
   0x9   :  { %s44_s22 = sshll.u32 %s3540_s21, 4  ;;  %p3285_p0 = scmp.ne.s32.totalorder %s4297_s1, %s3284_s25  ;;  %s45_s22 = int_to_ptr.vmem [resolvable:$true] %s44_s22 }
   0xa   :  { %p3288_p1 = scmp.lt.u32.totalorder %s3284_s25, %s4297_s1 }
   0xc   :  { %p3290_p2 = pnand %p3288_p1, %p3285_p0 }
   0xe   :  { %3293 = shalt.err (!%p3290_p2)
}
   0xf   :  { %s3294_s30 = scalar_lea.vmem %s45_s22, 128  ;;  %p3299_p4 = scmp.lt.s32.totalorder %s45_s22, %s45_s22 }
  0x10   :  { %p3295_p3 = scmp.ne.s32.totalorder %s45_s22, %s3294_s30  ;;  %p3300_p5 = scmp.lt.s32.totalorder %s3294_s30, %s3294_s30 }
  0x12   :  { %p3301_p6 = por %p3300_p5, %p3299_p4 }
  0x14   :  { %p3302_p7 = pnand %p3301_p6, %p3295_p3 }
  0x16   :  { %3305 = shalt.err (!%p3302_p7)
}
  0x17   :  { %47 = dma.hbm_to_vmem [thread:$0]  %s4297_s1, 128, %s45_s22, [#allocation6]  }
  0x18   :  { %s3541_s18 = smov [#allocation8]   ;;  %s3542_s20 = smov [#allocation11]  }
  0x19   :  { %s67_s19 = sshll.u32 %s3541_s18, 4  ;;  %s93_s21 = sshll.u32 %s3542_s20, 4  ;;  %s68_s19 = int_to_ptr.vmem [resolvable:$true] %s67_s19  ;;  %s94_s21 = int_to_ptr.vmem [resolvable:$true] %s93_s21 }
  0x1a   :  { %s3306_s25 = scalar_lea.hbm %s4300_s4, 2048 }
  0x1b   :  { %p3307_p8 = scmp.ne.s32.totalorder %s4300_s4, %s3306_s25  ;;  %p3310_p9 = scmp.lt.u32.totalorder %s3306_s25, %s4300_s4 }
  0x1d   :  { %p3312_p10 = pnand %p3310_p9, %p3307_p8 }
  0x1f   :  { %3315 = shalt.err (!%p3312_p10)
}
  0x20   :  { %s3316_s1 = scalar_lea.vmem %s68_s19, 2048  ;;  %p3321_p12 = scmp.lt.s32.totalorder %s68_s19, %s68_s19 }
  0x21   :  { %p3317_p11 = scmp.ne.s32.totalorder %s68_s19, %s3316_s1  ;;  %p3322_p13 = scmp.lt.s32.totalorder %s3316_s1, %s3316_s1 }
  0x23   :  { %p3323_p0 = por %p3322_p13, %p3321_p12 }
  0x25   :  { %p3324_p1 = pnand %p3323_p0, %p3317_p11 }
  0x27   :  { %3327 = shalt.err (!%p3324_p1)
}
  0x28   :  { %s3543_s22 = smov 128   ;;  %s3544_s30 = smov 8  }
  0x29   :  { %73 = dma.hbm_to_vmem [thread:$0]  %s4300_s4, 2048, %s68_s19, [#allocation9], %s3543_s22, %s3543_s22, %s3544_s30  }
  0x2a   :  { %s3328_s23 = scalar_lea.hbm %s4303_s7, 2048 }
  0x2b   :  { %p3329_p2 = scmp.ne.s32.totalorder %s4303_s7, %s3328_s23  ;;  %p3332_p3 = scmp.lt.u32.totalorder %s3328_s23, %s4303_s7 }
  0x2d   :  { %p3334_p4 = pnand %p3332_p3, %p3329_p2 }
  0x2f   :  { %3337 = shalt.err (!%p3334_p4)
}
  0x30   :  { %s3338_s28 = scalar_lea.vmem %s94_s21, 2048  ;;  %p3343_p6 = scmp.lt.s32.totalorder %s94_s21, %s94_s21 }
  0x31   :  { %p3339_p5 = scmp.ne.s32.totalorder %s94_s21, %s3338_s28  ;;  %p3344_p7 = scmp.lt.s32.totalorder %s3338_s28, %s3338_s28 }
  0x33   :  { %p3345_p8 = por %p3344_p7, %p3343_p6 }
  0x35   :  { %p3346_p9 = pnand %p3345_p8, %p3339_p5 }
  0x37   :  { %3349 = shalt.err (!%p3346_p9)
}
  0x38   :  { %99 = dma.hbm_to_vmem [thread:$0]  %s4303_s7, 2048, %s94_s21, [#allocation12], %s3543_s22, %s3543_s22, %s3544_s30  }
  0x39   :  { %s3545_s29 = smov [#allocation14]   ;;  %s3546_s0 = smov [#allocation2]  }
  0x3a   :  { %s119_s1 = sshll.u32 %s3545_s29, 4  ;;  %s34_s17 = sshll.u32 %s3546_s0, 4  ;;  %s120_s1 = int_to_ptr.vmem [resolvable:$true] %s119_s1  ;;  %s35_s17 = int_to_ptr.vmem [resolvable:$true] %s34_s17 }
  0x3b   :  { %s3350_s23 = scalar_lea.hbm %s4306_s10, 6144 }
  0x3c   :  { %p3351_p10 = scmp.ne.s32.totalorder %s4306_s10, %s3350_s23  ;;  %p3354_p11 = scmp.lt.u32.totalorder %s3350_s23, %s4306_s10 }
  0x3e   :  { %p3356_p12 = pnand %p3354_p11, %p3351_p10 }
  0x40   :  { %3359 = shalt.err (!%p3356_p12)
}
  0x41   :  { %s3360_s7 = scalar_lea.vmem %s120_s1, 6144  ;;  %p3365_p0 = scmp.lt.s32.totalorder %s120_s1, %s120_s1 }
  0x42   :  { %p3361_p13 = scmp.ne.s32.totalorder %s120_s1, %s3360_s7  ;;  %p3366_p1 = scmp.lt.s32.totalorder %s3360_s7, %s3360_s7 }
  0x44   :  { %p3367_p2 = por %p3366_p1, %p3365_p0 }
  0x46   :  { %p3368_p3 = pnand %p3367_p2, %p3361_p13 }
  0x48   :  { %3371 = shalt.err (!%p3368_p3)
}
  0x49   :  { %s3547_s21 = smov 384   ;;  %s3548_s28 = smov 24  }
  0x4a   :  { %125 = dma.hbm_to_vmem [thread:$0]  %s4306_s10, 6144, %s120_s1, [#allocation15], %s3547_s21, %s3547_s21, %s3548_s28  }
  0x4b   :  { %s4342_s18 = sld [smem:[#allocation45_spill]] }
  0x51   :  { %s3372_s20 = scalar_lea.hbm %s4342_s18, 128 }
  0x52   :  { %p3373_p4 = scmp.ne.s32.totalorder %s4342_s18, %s3372_s20  ;;  %p3376_p5 = scmp.lt.u32.totalorder %s3372_s20, %s4342_s18 }
  0x54   :  { %p3378_p6 = pnand %p3376_p5, %p3373_p4 }
  0x56   :  { %3381 = shalt.err (!%p3378_p6)
}
  0x57   :  { %s3382_s27 = scalar_lea.vmem %s35_s17, 128  ;;  %p3387_p8 = scmp.lt.s32.totalorder %s35_s17, %s35_s17 }
  0x58   :  { %p3383_p7 = scmp.ne.s32.totalorder %s35_s17, %s3382_s27  ;;  %p3388_p9 = scmp.lt.s32.totalorder %s3382_s27, %s3382_s27 }
  0x5a   :  { %p3389_p10 = por %p3388_p9, %p3387_p8 }
  0x5c   :  { %p3390_p11 = pnand %p3389_p10, %p3383_p7 }
  0x5e   :  { %3393 = shalt.err (!%p3390_p11)
}
  0x5f   :  { %37 = dma.hbm_to_vmem [thread:$0]  %s4342_s18, 128, %s35_s17, [#allocation3]  }
  0x60   :  { %s3549_s7 = smov [#allocation7]   ;;  %s3550_s19 = smov [#allocation10]  }
  0x61   :  { %s53_s4 = sshll.u32 %s3549_s7, 4  ;;  %s79_s29 = sshll.u32 %s3550_s19, 4  ;;  %s54_s4 = int_to_ptr.vmem [resolvable:$true] %s53_s4  ;;  %s80_s29 = int_to_ptr.vmem [resolvable:$true] %s79_s29 }
  0x62   :  { %s3394_s23 = scalar_lea.hbm %s4298_s2, 2048 }
  0x63   :  { %p3395_p12 = scmp.ne.s32.totalorder %s4298_s2, %s3394_s23  ;;  %p3398_p13 = scmp.lt.u32.totalorder %s3394_s23, %s4298_s2 }
  0x65   :  { %p3400_p0 = pnand %p3398_p13, %p3395_p12 }
  0x67   :  { %3403 = shalt.err (!%p3400_p0)
}
  0x68   :  { %s3404_s17 = scalar_lea.vmem %s54_s4, 2048  ;;  %p3409_p2 = scmp.lt.s32.totalorder %s54_s4, %s54_s4 }
  0x69   :  { %p3405_p1 = scmp.ne.s32.totalorder %s54_s4, %s3404_s17  ;;  %p3410_p3 = scmp.lt.s32.totalorder %s3404_s17, %s3404_s17 }
  0x6b   :  { %p3411_p4 = por %p3410_p3, %p3409_p2 }
  0x6d   :  { %p3412_p5 = pnand %p3411_p4, %p3405_p1 }
  0x6f   :  { %3415 = shalt.err (!%p3412_p5)
}
  0x70   :  { %59 = dma.hbm_to_vmem [thread:$0]  %s4298_s2, 2048, %s54_s4, [#allocation6], %s3543_s22, %s3543_s22, %s3544_s30  }
  0x71   :  { %s3416_s19 = scalar_lea.hbm %s4301_s5, 2048 }
  0x72   :  { %p3417_p6 = scmp.ne.s32.totalorder %s4301_s5, %s3416_s19  ;;  %p3420_p7 = scmp.lt.u32.totalorder %s3416_s19, %s4301_s5 }
  0x74   :  { %p3422_p8 = pnand %p3420_p7, %p3417_p6 }
  0x76   :  { %3425 = shalt.err (!%p3422_p8)
}
  0x77   :  { %s3426_s25 = scalar_lea.vmem %s80_s29, 2048  ;;  %p3431_p10 = scmp.lt.s32.totalorder %s80_s29, %s80_s29 }
  0x78   :  { %p3427_p9 = scmp.ne.s32.totalorder %s80_s29, %s3426_s25  ;;  %p3432_p11 = scmp.lt.s32.totalorder %s3426_s25, %s3426_s25 }
  0x7a   :  { %p3433_p12 = por %p3432_p11, %p3431_p10 }
  0x7c   :  { %p3434_p13 = pnand %p3433_p12, %p3427_p9 }
  0x7e   :  { %3437 = shalt.err (!%p3434_p13)
}
  0x7f   :  { %85 = dma.hbm_to_vmem [thread:$0]  %s4301_s5, 2048, %s80_s29, [#allocation9], %s3543_s22, %s3543_s22, %s3544_s30  }
  0x80   :  { %s3551_s26 = smov [#allocation13]   ;;  %s3552_s17 = smov [#allocation16]  }
  0x81   :  { %s107_s27 = sshll.u32 %s3551_s26, 4  ;;  %s135_s18 = sshll.u32 %s3552_s17, 4  ;;  %s108_s27 = int_to_ptr.vmem [resolvable:$true] %s107_s27  ;;  %s136_s18 = int_to_ptr.vmem [resolvable:$true] %s135_s18 }
  0x82   :  { %s3438_s7 = scalar_lea.hbm %s4305_s9, 6144 }
  0x83   :  { %p3439_p0 = scmp.ne.s32.totalorder %s4305_s9, %s3438_s7  ;;  %p3442_p1 = scmp.lt.u32.totalorder %s3438_s7, %s4305_s9 }
  0x85   :  { %p3444_p2 = pnand %p3442_p1, %p3439_p0 }
  0x87   :  { %3447 = shalt.err (!%p3444_p2)
}
  0x88   :  { %s3448_s5 = scalar_lea.vmem %s108_s27, 6144  ;;  %p3453_p4 = scmp.lt.s32.totalorder %s108_s27, %s108_s27 }
  0x89   :  { %p3449_p3 = scmp.ne.s32.totalorder %s108_s27, %s3448_s5  ;;  %p3454_p5 = scmp.lt.s32.totalorder %s3448_s5, %s3448_s5 }
  0x8b   :  { %p3455_p6 = por %p3454_p5, %p3453_p4 }
  0x8d   :  { %p3456_p7 = pnand %p3455_p6, %p3449_p3 }
  0x8f   :  { %3459 = shalt.err (!%p3456_p7)
}
  0x90   :  { %113 = dma.hbm_to_vmem [thread:$0]  %s4305_s9, 6144, %s108_s27, [#allocation12], %s3547_s21, %s3547_s21, %s3548_s28  }
  0x91   :  { %s3460_s4 = scalar_lea.hbm %s4309_s13, 2048 }
  0x92   :  { %p3461_p8 = scmp.ne.s32.totalorder %s4309_s13, %s3460_s4  ;;  %p3464_p9 = scmp.lt.u32.totalorder %s3460_s4, %s4309_s13 }
  0x94   :  { %p3466_p10 = pnand %p3464_p9, %p3461_p8 }
  0x96   :  { %3469 = shalt.err (!%p3466_p10)
}
  0x97   :  { %s3470_s7 = scalar_lea.vmem %s136_s18, 2048  ;;  %p3475_p12 = scmp.lt.s32.totalorder %s136_s18, %s136_s18 }
  0x98   :  { %p3471_p11 = scmp.ne.s32.totalorder %s136_s18, %s3470_s7  ;;  %p3476_p13 = scmp.lt.s32.totalorder %s3470_s7, %s3470_s7 }
  0x9a   :  { %p3477_p0 = por %p3476_p13, %p3475_p12 }
  0x9c   :  { %p3478_p1 = pnand %p3477_p0, %p3471_p11 }
  0x9e   :  { %3481 = shalt.err (!%p3478_p1)
}
  0x9f   :  { %141 = dma.hbm_to_vmem [thread:$0]  %s4309_s13, 2048, %s136_s18, [#allocation15], %s3543_s22, %s3543_s22, %s3544_s30  }
  0xa0   :  { %s3553_s28 = smov [#allocation17]   ;;  %s3482_s20 = scalar_lea.hbm %s4310_s14, 2048 }
  0xa1   :  { %s147_s27 = sshll.u32 %s3553_s28, 4  ;;  %p3483_p2 = scmp.ne.s32.totalorder %s4310_s14, %s3482_s20  ;;  %s148_s27 = int_to_ptr.vmem [resolvable:$true] %s147_s27 }
  0xa2   :  { %p3486_p3 = scmp.lt.u32.totalorder %s3482_s20, %s4310_s14 }
  0xa4   :  { %p3488_p4 = pnand %p3486_p3, %p3483_p2 }
  0xa6   :  { %3491 = shalt.err (!%p3488_p4)
}
  0xa7   :  { %s3492_s25 = scalar_lea.vmem %s148_s27, 2048  ;;  %p3497_p6 = scmp.lt.s32.totalorder %s148_s27, %s148_s27 }
  0xa8   :  { %p3493_p5 = scmp.ne.s32.totalorder %s148_s27, %s3492_s25  ;;  %p3498_p7 = scmp.lt.s32.totalorder %s3492_s25, %s3492_s25 }
  0xaa   :  { %p3499_p8 = por %p3498_p7, %p3497_p6 }
  0xac   :  { %p3500_p9 = pnand %p3499_p8, %p3493_p5 }
  0xae   :  { %3503 = shalt.err (!%p3500_p9)
}
  0xaf   :  { %153 = dma.hbm_to_vmem [thread:$0]  %s4310_s14, 2048, %s148_s27, [#allocation18], %s3543_s22, %s3543_s22, %s3544_s30  }
  0xb0   :  { %3526 = dma.done.wait [#allocation3], 128  }
  0xb1   :  { %3527 = vsyncadd [#allocation3], 4294967168 }
  0xb2   :  { %3528 = dma.done.wait [#allocation6], 2176  }
  0xb3   :  { %3529 = vsyncadd [#allocation6], 4294965120 }
  0xb4   :  { %3530 = dma.done.wait [#allocation9], 4096  }
  0xb5   :  { %3531 = vsyncadd [#allocation9], 4294963200 }
  0xb6   :  { %3532 = dma.done.wait [#allocation12], 8192  }
  0xb7   :  { %3533 = vsyncadd [#allocation12], 4294959104 }
  0xb8   :  { %3534 = dma.done.wait [#allocation15], 8192  }
  0xb9   :  { %3535 = vsyncadd [#allocation15], 4294959104 }
  0xba   :  { %3536 = dma.done.wait [#allocation18], 2048  }
  0xbb   :  { %3537 = vsyncadd [#allocation18], 4294965248  ;;  %v4325_v0 = vmov 0.0|0.0   ;;  %vm3555_vm0 = vmmov 0   ;;  %v4314_v1 = vmov 0.0   ;;  %v187_v2 = vld [vmem:[#allocation7] sm:$0xff] }
  0xbc   :  { %2688 = vmatprep.subr.bf16.mxu0 %v4325_v0  ;;  %2230 = vmatprep.mubr.msk.f32.mxu0 %vm3555_vm0, %v4314_v1  ;;  %v188_v3 = vld [vmem:[#allocation7 + $0x8] sm:$0xff]  ;;  %v189_v4 = vld [vmem:[#allocation7 + $0x10] sm:$0xff]  ;;  %v190_v6 = vld [vmem:[#allocation7 + $0x18] sm:$0xff]  ;;  %s3557_s10 = smov [#allocation19]  }
  0xbd   :  { %2712 = vmatprep.subr.bf16.mxu1 %v4325_v0  ;;  %2265 = vmatprep.mubr.msk.f32.mxu1 %vm3555_vm0, %v4314_v1  ;;  %v2689_v5 = vpack.c.bf16 %v188_v3, %v187_v2  ;;  %v2692_v7 = vpack.c.bf16 %v190_v6, %v189_v4  ;;  %v191_v8 = vld [vmem:[#allocation7 + $0x20] sm:$0xff]  ;;  %v192_v9 = vld [vmem:[#allocation7 + $0x28] sm:$0xff]  ;;  %v299_v14 = vld [vmem:[#allocation10 + $0x10] sm:$0xff]  ;;  %s1942_s1 = sshll.u32 %s3557_s10, 4  ;;  %s1943_s1 = int_to_ptr.vmem [resolvable:$true] %s1942_s1 }
  0xbe   :  { %v297_v10 = vld [vmem:[#allocation10] sm:$0xff]  ;;  %v298_v11 = vld [vmem:[#allocation10 + $0x8] sm:$0xff]  ;;  %v2695_v12 = vpack.c.bf16 %v192_v9, %v191_v8  ;;  %v300_v15 = vld [vmem:[#allocation10 + $0x18] sm:$0xff]  ;;  %s3504_s7 = scalar_lea.vmem %s1943_s1, 128  ;;  %p3509_p11 = scmp.lt.s32.totalorder %s1943_s1, %s1943_s1 }
  0xbf   :  { %2690 = vmatpush3.bf16.msra.mxu0 %v2689_v5  ;;  %v2713_v13 = vpack.c.bf16 %v298_v11, %v297_v10  ;;  %v193_v16 = vld [vmem:[#allocation7 + $0x30] sm:$0xff]  ;;  %v194_v17 = vld [vmem:[#allocation7 + $0x38] sm:$0xff]  ;;  %v2716_v18 = vpack.c.bf16 %v300_v15, %v299_v14  ;;  %v301_v19 = vld [vmem:[#allocation10 + $0x20] sm:$0xff]  ;;  %p3505_p10 = scmp.ne.s32.totalorder %s1943_s1, %s3504_s7  ;;  %p3510_p12 = scmp.lt.s32.totalorder %s3504_s7, %s3504_s7 }
  0xc0   :  { %2691 = vmatprep.subr.bf16.mxu0 %v4325_v0  ;;  %v302_v20 = vld [vmem:[#allocation10 + $0x28] sm:$0xff]  ;;  %v2698_v21 = vpack.c.bf16 %v194_v17, %v193_v16  ;;  %v195_v22 = vld [vmem:[#allocation7 + $0x40] sm:$0xff]  ;;  %v303_v25 = vld [vmem:[#allocation10 + $0x30] sm:$0xff] }
  0xc1   :  { %2714 = vmatpush3.bf16.msra.mxu1 %v2713_v13  ;;  %v196_v23 = vld [vmem:[#allocation7 + $0x48] sm:$0xff]  ;;  %v2719_v24 = vpack.c.bf16 %v302_v20, %v301_v19  ;;  %v304_v26 = vld [vmem:[#allocation10 + $0x38] sm:$0xff]  ;;  %v197_v28 = vld [vmem:[#allocation7 + $0x50] sm:$0xff]  ;;  %p3511_p13 = por %p3510_p12, %p3509_p11 }
  0xc2   :  { %2715 = vmatprep.subr.bf16.mxu1 %v4325_v0  ;;  %v2701_v27 = vpack.c.bf16 %v196_v23, %v195_v22  ;;  %v198_v29 = vld [vmem:[#allocation7 + $0x58] sm:$0xff]  ;;  %v2722_v30 = vpack.c.bf16 %v304_v26, %v303_v25  ;;  %v305_v31 = vld [vmem:[#allocation10 + $0x40] sm:$0xff]  ;;  %v306_v32 = vld [vmem:[#allocation10 + $0x48] sm:$0xff] }
  0xc3   :  { %2693 = vmatpush3.bf16.msra.mxu0 %v2692_v7  ;;  %v2704_v33 = vpack.c.bf16 %v198_v29, %v197_v28  ;;  %v199_v34 = vld [vmem:[#allocation7 + $0x60] sm:$0xff]  ;;  %v200_v35 = vld [vmem:[#allocation7 + $0x68] sm:$0xff]  ;;  %v2725_v36 = vpack.c.bf16 %v306_v32, %v305_v31  ;;  %v307_v37 = vld [vmem:[#allocation10 + $0x50] sm:$0xff]  ;;  %p3512_p0 = pnand %p3511_p13, %p3505_p10 }
  0xc4   :  { %2694 = vmatprep.subr.bf16.mxu0 %v4325_v0  ;;  %v308_v38 = vld [vmem:[#allocation10 + $0x58] sm:$0xff]  ;;  %v2707_v39 = vpack.c.bf16 %v200_v35, %v199_v34  ;;  %v201_v40 = vld [vmem:[#allocation7 + $0x70] sm:$0xff]  ;;  %v309_v43 = vld [vmem:[#allocation10 + $0x60] sm:$0xff] }
  0xc5   :  { %2717 = vmatpush3.bf16.msra.mxu1 %v2716_v18  ;;  %v202_v41 = vld [vmem:[#allocation7 + $0x78] sm:$0xff]  ;;  %v2728_v42 = vpack.c.bf16 %v308_v38, %v307_v37  ;;  %v310_v44 = vld [vmem:[#allocation10 + $0x68] sm:$0xff]  ;;  %v280_v46 = vld [vmem:[#allocation8] sm:$0xff] }
  0xc6   :  { %2718 = vmatprep.subr.bf16.mxu1 %v4325_v0  ;;  %v2710_v45 = vpack.c.bf16 %v202_v41, %v201_v40  ;;  %v281_v47 = vld [vmem:[#allocation8 + $0x8] sm:$0xff]  ;;  %v2731_v48 = vpack.c.bf16 %v310_v44, %v309_v43  ;;  %v311_v49 = vld [vmem:[#allocation10 + $0x70] sm:$0xff]  ;;  %v312_v50 = vld [vmem:[#allocation10 + $0x78] sm:$0xff] }
  0xc7   :  { %2696 = vmatpush3.bf16.msra.mxu0 %v2695_v12  ;;  %v186_v51 = vld [vmem:[#allocation2] sm:$0xff]  ;;  %v2737_v52 = vpack.c.bf16 %v281_v47, %v280_v46  ;;  %v283_v54 = vld [vmem:[#allocation8 + $0x18] sm:$0xff]  ;;  %v2734_v55 = vpack.c.bf16 %v312_v50, %v311_v49  ;;  %v284_v57 = vld [vmem:[#allocation8 + $0x20] sm:$0xff] }
  0xc8   :  { %2697 = vmatprep.subr.bf16.mxu0 %v4325_v0  ;;  %v282_v53 = vld [vmem:[#allocation8 + $0x10] sm:$0xff]  ;;  %v285_v58 = vld [vmem:[#allocation8 + $0x28] sm:$0xff]  ;;  %v287_v61 = vld [vmem:[#allocation8 + $0x38] sm:$0xff] }
  0xc9   :  { %2720 = vmatpush3.bf16.msra.mxu1 %v2719_v24  ;;  %v2740_v56 = vpack.c.bf16 %v283_v54, %v282_v53  ;;  %v2743_v59 = vpack.c.bf16 %v285_v58, %v284_v57  ;;  %v286_v60 = vld [vmem:[#allocation8 + $0x30] sm:$0xff]  ;;  %v288_v63 = vld [vmem:[#allocation8 + $0x40] sm:$0xff]  ;;  %v289_v2 = vld [vmem:[#allocation8 + $0x48] sm:$0xff] }
  0xca   :  { %2721 = vmatprep.subr.bf16.mxu1 %v4325_v0  ;;  %v2746_v62 = vpack.c.bf16 %v287_v61, %v286_v60  ;;  %v2749_v3 = vpack.c.bf16 %v289_v2, %v288_v63  ;;  %v290_v4 = vld [vmem:[#allocation8 + $0x50] sm:$0xff]  ;;  %v291_v5 = vld [vmem:[#allocation8 + $0x58] sm:$0xff]  ;;  %v292_v7 = vld [vmem:[#allocation8 + $0x60] sm:$0xff] }
  0xcb   :  { %2699 = vmatpush3.bf16.msra.mxu0 %v2698_v21  ;;  %v2752_v6 = vpack.c.bf16 %v291_v5, %v290_v4  ;;  %v293_v8 = vld [vmem:[#allocation8 + $0x68] sm:$0xff]  ;;  %v294_v10 = vld [vmem:[#allocation8 + $0x70] sm:$0xff]  ;;  %v295_v11 = vld [vmem:[#allocation8 + $0x78] sm:$0xff] }
  0xcc   :  { %2700 = vmatprep.subr.bf16.mxu0 %v4325_v0  ;;  %v2755_v9 = vpack.c.bf16 %v293_v8, %v292_v7  ;;  %v2758_v12 = vpack.c.bf16 %v295_v11, %v294_v10  ;;  %v296_v13 = vld [vmem:[#allocation5] sm:$0xff]  ;;  %v469_v14 = vld [vmem:[#allocation11] sm:$0xff]  ;;  %v470_v15 = vld [vmem:[#allocation11 + $0x8] sm:$0xff] }
  0xcd   :  { %2723 = vmatpush3.bf16.msra.mxu1 %v2722_v30  ;;  %v3820_v16 = vpack.c.bf16 %v470_v15, %v469_v14  ;;  %v1956_v17 = vld [vmem:[%s4299_s3] ss:$0 sm:$0xff]  ;;  %v472_v24 = vld [vmem:[#allocation11 + $0x18] sm:$0xff]  ;;  %v473_v26 = vld [vmem:[#allocation11 + $0x20] sm:$0xff] }
  0xce   :  { %2724 = vmatprep.subr.bf16.mxu1 %v4325_v0  ;;  %v471_v23 = vld [vmem:[#allocation11 + $0x10] sm:$0xff]  ;;  %v476_v30 = vld [vmem:[#allocation11 + $0x38] sm:$0xff]  ;;  %v477_v32 = vld [vmem:[#allocation11 + $0x40] sm:$0xff] }
  0xcf   :  { %2702 = vmatpush3.bf16.msra.mxu0 %v2701_v27  ;;  %v3830_v25 = vpack.c.bf16 %v472_v24, %v471_v23  ;;  %v474_v27 = vld [vmem:[#allocation11 + $0x28] sm:$0xff]  ;;  %v475_v29 = vld [vmem:[#allocation11 + $0x30] sm:$0xff]  ;;  %v481_v38 = vld [vmem:[#allocation11 + $0x60] sm:$0xff] }
  0xd0   :  { %2703 = vmatprep.subr.bf16.mxu0 %v4325_v0  ;;  %v3834_v28 = vpack.c.bf16 %v474_v27, %v473_v26  ;;  %v3837_v31 = vpack.c.bf16 %v476_v30, %v475_v29  ;;  %v479_v35 = vld [vmem:[#allocation11 + $0x50] sm:$0xff]  ;;  %v563_v44 = vld [vmem:[#allocation13 + $0x8] sm:$0xff]  ;;  %v562_v46 = vld [vmem:[#allocation13] sm:$0xff] }
  0xd1   :  { %2726 = vmatpush3.bf16.msra.mxu1 %v2725_v36  ;;  %v480_v36 = vld [vmem:[#allocation11 + $0x58] sm:$0xff]  ;;  %v483_v41 = vld [vmem:[#allocation11 + $0x70] sm:$0xff]  ;;  %v571_v54 = vld [vmem:[#allocation13 + $0x48] sm:$0xff] }
  0xd2   :  { %2727 = vmatprep.subr.bf16.mxu1 %v4325_v0  ;;  %v3845_v37 = vpack.c.bf16 %v480_v36, %v479_v35  ;;  %v569_v50 = vld [vmem:[#allocation13 + $0x38] sm:$0xff]  ;;  %v578_v57 = vld [vmem:[#allocation13 + $0x80] sm:$0xff]  ;;  %v584_v63 = vld [vmem:[#allocation13 + $0xb0] sm:$0xff] }
  0xd3   :  { %2705 = vmatpush3.bf16.msra.mxu0 %v2704_v33  ;;  %v478_v33 = vld [vmem:[#allocation11 + $0x48] sm:$0xff]  ;;  %v577_v60 = vld [vmem:[#allocation13 + $0x78] sm:$0xff]  ;;  %v590_v7 = vld [vmem:[#allocation13 + $0xe0] sm:$0xff] }
  0xd4   :  { %2706 = vmatprep.subr.bf16.mxu0 %v4325_v0  ;;  %v3841_v34 = vpack.c.bf16 %v478_v33, %v477_v32  ;;  %4344 = vst [vmem:[#allocation28_spill] sm:$0xff] %v3845_v37  ;;  %v583_v4 = vld [vmem:[#allocation13 + $0xa8] sm:$0xff]  ;;  %v589_v10 = vld [vmem:[#allocation13 + $0xd8] sm:$0xff]  ;;  %v592_v15 = vld [vmem:[#allocation13 + $0xf0] sm:$0xff] }
  0xd5   :  { %2729 = vmatpush3.bf16.msra.mxu1 %v2728_v42  ;;  %v484_v42 = vld [vmem:[#allocation11 + $0x78] sm:$0xff]  ;;  %v598_v23 = vld [vmem:[#allocation13 + $0x120] sm:$0xff]  ;;  %v608_v29 = vld [vmem:[#allocation13 + $0x170] sm:$0xff] }
  0xd6   :  { %2730 = vmatprep.subr.bf16.mxu1 %v4325_v0  ;;  %4343 = vst [vmem:[#allocation27_spill] sm:$0xff] %v3841_v34  ;;  %v3853_v43 = vpack.c.bf16 %v484_v42, %v483_v41  ;;  %v601_v24 = vld [vmem:[#allocation13 + $0x138] sm:$0xff]  ;;  %v604_v32 = vld [vmem:[#allocation13 + $0x150] sm:$0xff]  ;;  %v607_v33 = vld [vmem:[#allocation13 + $0x168] sm:$0xff] }
  0xd7   :  { %2708 = vmatpush3.bf16.msra.mxu0 %v2707_v39  ;;  %v482_v39 = vld [vmem:[#allocation11 + $0x68] sm:$0xff]  ;;  %v3896_v26 = vpack.c.bf16 %v601_v24, %v598_v23  ;;  %v605_v27 = vld [vmem:[#allocation13 + $0x158] sm:$0xff]  ;;  %v3902_v35 = vpack.c.bf16 %v607_v33, %v604_v32 }
  0xd8   :  { %2709 = vmatprep.subr.bf16.mxu0 %v4325_v0  ;;  %v3849_v40 = vpack.c.bf16 %v482_v39, %v481_v38  ;;  %4346 = vst [vmem:[#allocation30_spill] sm:$0xff] %v3853_v43  ;;  %v3899_v30 = vpack.c.bf16 %v608_v29, %v605_v27  ;;  %v1957_v38 = vld [vmem:[%s4302_s6] ss:$0 sm:$0xff]  ;;  %v603_v23 = vld [vmem:[#allocation13 + $0x148] sm:$0xff]  ;;  %v606_v27 = vld [vmem:[#allocation13 + $0x160] sm:$0xff] }
  0xd9   :  { %2732 = vmatpush3.bf16.msra.mxu1 %v2731_v48  ;;  %v565_v48 = vld [vmem:[#allocation13 + $0x18] sm:$0xff]  ;;  %4352 = vst [vmem:[#allocation36_spill] sm:$0xff] %v3896_v26  ;;  %4354 = vst [vmem:[#allocation38_spill] sm:$0xff] %v3902_v35  ;;  %v769_v33 = vld [vmem:[#allocation14 + $0x8] sm:$0xff] }
  0xda   :  { %2733 = vmatprep.subr.bf16.mxu1 %v4325_v0  ;;  %4345 = vst [vmem:[#allocation29_spill] sm:$0xff] %v3849_v40  ;;  %v3860_v49 = vpack.c.bf16 %v565_v48, %v562_v46  ;;  %4353 = vst [vmem:[#allocation37_spill] sm:$0xff] %v3899_v30  ;;  %v609_v29 = vld [vmem:[#allocation13 + $0x178] sm:$0xff] }
  0xdb   :  { %2711 = vmatpush3.bf16.msra.mxu0 %v2710_v45  ;;  %v566_v45 = vld [vmem:[#allocation13 + $0x20] sm:$0xff]  ;;  %v3944_v32 = vpack.c.bf16 %v609_v29, %v606_v27  ;;  %v782_v27 = vld [vmem:[#allocation14 + $0x70] sm:$0xff]  ;;  %v785_v29 = vld [vmem:[#allocation14 + $0x88] sm:$0xff] }
  0xdc   :  { %2736 = vmatprep.subr.bf16.mxu0 %v4325_v0  ;;  %v3858_v47 = vpack.c.bf16 %v566_v45, %v563_v44 }
  0xdd   :  { %2735 = vmatpush3.bf16.msra.mxu1 %v2734_v55 }
  0xde   :  { %2231 = vmatmul.mubr.f32.vlgmr.msra.gmra.mrb[0].mxu0 %v186_v51  ;;  %2760 = vmatprep.subr.bf16.mxu1 %v4325_v0  ;;  %v572_v51 = vld [vmem:[#allocation13 + $0x50] sm:$0xff] }
  0xdf   :  { %2738 = vmatpush3.bf16.msra.mxu0 %v2737_v52  ;;  %2300 = vmatprep.mubr.msk.f32.mxu0 %vm3555_vm0, %v4314_v1  ;;  %v568_v52 = vld [vmem:[#allocation13 + $0x30] sm:$0xff]  ;;  %v3863_v53 = vpack.c.bf16 %v572_v51, %v569_v50 }
  0xe0   :  { %2739 = vmatprep.subr.bf16.mxu0 %v4325_v0  ;;  %2266 = vmatmul.mubr.f32.vlgmr.msra.gmra.mrb[0].mxu1 %v296_v13  ;;  %v3866_v55 = vpack.c.bf16 %v571_v54, %v568_v52  ;;  %v596_v13 = vld [vmem:[#allocation13 + $0x110] sm:$0xff]  ;;  %v567_v54 = vld [vmem:[#allocation13 + $0x28] sm:$0xff] }
  0xe1   :  { %2335 = vmatprep.mubr.msk.f32.mxu1 %vm3555_vm0, %v4314_v1  ;;  %2762 = vmatpush3.bf16.msra.mxu1 %v3820_v16  ;;  %v564_v52 = vld [vmem:[#allocation13 + $0x10] sm:$0xff] }
  0xe2   :  { %2763 = vmatprep.subr.bf16.mxu1 %v4325_v0 }
  0xe3   :  { %2741 = vmatpush3.bf16.msra.mxu0 %v2740_v56  ;;  %v575_v56 = vld [vmem:[#allocation13 + $0x68] sm:$0xff] }
  0xe4   :  { %2742 = vmatprep.subr.bf16.mxu0 %v4325_v0  ;;  %v3869_v58 = vpack.c.bf16 %v578_v57, %v575_v56  ;;  %v3914_v57 = vpack.c.bf16 %v567_v54, %v564_v52 }
  0xe5   :  { %2765 = vmatpush3.bf16.msra.mxu1 %v3830_v25 }
  0xe6   :  { %2766 = vmatprep.subr.bf16.mxu1 %v4325_v0 }
  0xe7   :  { %2744 = vmatpush3.bf16.msra.mxu0 %v2743_v59  ;;  %v574_v59 = vld [vmem:[#allocation13 + $0x60] sm:$0xff] }
  0xe8   :  { %2745 = vmatprep.subr.bf16.mxu0 %v4325_v0  ;;  %v3872_v61 = vpack.c.bf16 %v577_v60, %v574_v59  ;;  %v573_v60 = vld [vmem:[#allocation13 + $0x58] sm:$0xff] }
  0xe9   :  { %2768 = vmatpush3.bf16.msra.mxu1 %v3834_v28 }
  0xea   :  { %2769 = vmatprep.subr.bf16.mxu1 %v4325_v0 }
  0xeb   :  { %2747 = vmatpush3.bf16.msra.mxu0 %v2746_v62  ;;  %v581_v62 = vld [vmem:[#allocation13 + $0x98] sm:$0xff] }
  0xec   :  { %2748 = vmatprep.subr.bf16.mxu0 %v4325_v0  ;;  %v3875_v2 = vpack.c.bf16 %v584_v63, %v581_v62  ;;  %v576_v63 = vld [vmem:[#allocation13 + $0x70] sm:$0xff] }
  0xed   :  { %2771 = vmatpush3.bf16.msra.mxu1 %v3837_v31 }
  0xee   :  { %2772 = vmatprep.subr.bf16.mxu1 %v4325_v0 }
  0xef   :  { %2750 = vmatpush3.bf16.msra.mxu0 %v2749_v3  ;;  %v580_v3 = vld [vmem:[#allocation13 + $0x90] sm:$0xff] }
  0xf0   :  { %2751 = vmatprep.subr.bf16.mxu0 %v4325_v0  ;;  %v3878_v5 = vpack.c.bf16 %v583_v4, %v580_v3  ;;  %v579_v3 = vld [vmem:[#allocation13 + $0x88] sm:$0xff] }
  0xf1   :  { %2774 = vmatpush3.bf16.msra.mxu1 %v3841_v34  ;;  %v3924_v4 = vpack.c.bf16 %v579_v3, %v576_v63  ;;  %v777_v63 = vld [vmem:[#allocation14 + $0x48] sm:$0xff]  ;;  %v776_v3 = vld [vmem:[#allocation14 + $0x40] sm:$0xff] }
  0xf2   :  { %2775 = vmatprep.subr.bf16.mxu1 %v4325_v0 }
  0xf3   :  { %2753 = vmatpush3.bf16.msra.mxu0 %v2752_v6  ;;  %v587_v6 = vld [vmem:[#allocation13 + $0xc8] sm:$0xff] }
  0xf4   :  { %2754 = vmatprep.subr.bf16.mxu0 %v4325_v0  ;;  %v3881_v8 = vpack.c.bf16 %v590_v7, %v587_v6  ;;  %v582_v6 = vld [vmem:[#allocation13 + $0xa0] sm:$0xff]  ;;  %v585_v7 = vld [vmem:[#allocation13 + $0xb8] sm:$0xff] }
  0xf5   :  { %2777 = vmatpush3.bf16.msra.mxu1 %v3845_v37 }
  0xf6   :  { %2778 = vmatprep.subr.bf16.mxu1 %v4325_v0  ;;  %4347 = vst [vmem:[#allocation31_spill] sm:$0xff] %v3881_v8 }
  0xf7   :  { %2756 = vmatpush3.bf16.msra.mxu0 %v2755_v9  ;;  %v586_v9 = vld [vmem:[#allocation13 + $0xc0] sm:$0xff] }
  0xf8   :  { %2757 = vmatprep.subr.bf16.mxu0 %v4325_v0  ;;  %v3884_v11 = vpack.c.bf16 %v589_v10, %v586_v9  ;;  %v3928_v9 = vpack.c.bf16 %v585_v7, %v582_v6  ;;  %v588_v10 = vld [vmem:[#allocation13 + $0xd0] sm:$0xff]  ;;  %v779_v6 = vld [vmem:[#allocation14 + $0x58] sm:$0xff]  ;;  %v781_v7 = vld [vmem:[#allocation14 + $0x68] sm:$0xff] }
  0xf9   :  { %2780 = vmatpush3.bf16.msra.mxu1 %v3849_v40 }
  0xfa   :  { %2781 = vmatprep.subr.bf16.mxu1 %v4325_v0  ;;  %4348 = vst [vmem:[#allocation32_spill] sm:$0xff] %v3884_v11 }
  0xfb   :  { %2759 = vmatpush3.bf16.msra.mxu0 %v2758_v12  ;;  %v593_v12 = vld [vmem:[#allocation13 + $0xf8] sm:$0xff] }
  0xfc   :  { %2785 = vmatprep.subr.bf16.mxu0 %v3858_v47  ;;  %v3887_v14 = vpack.c.bf16 %v596_v13, %v593_v12  ;;  %v591_v12 = vld [vmem:[#allocation13 + $0xe8] sm:$0xff] }
  0xfd   :  { %2783 = vmatpush3.bf16.msra.mxu1 %v3853_v43  ;;  %v3932_v13 = vpack.c.bf16 %v591_v12, %v588_v10  ;;  %v784_v10 = vld [vmem:[#allocation14 + $0x80] sm:$0xff] }
  0xfe   :  { %2816 = vmatprep.subr.bf16.mxu1 %v4325_v0  ;;  %4349 = vst [vmem:[#allocation33_spill] sm:$0xff] %v3887_v14 }
 0x1b1   :  { %v276_v18 = vpop.f32.mrb[0].mxu0 }
 0x1b2   :  { %v277_v19 = vadd.f32 %v1956_v17, %v276_v18  ;;  %v2232_v20 = vpop.f32.mrb[1].mxu0  ;;  %v595_v17 = vld [vmem:[#allocation13 + $0x108] sm:$0xff] }
 0x1b3   :  { %v3828_v21 = vpop.f32.mrb[0].mxu1  ;;  %v3890_v18 = vpack.c.bf16 %v595_v17, %v592_v15  ;;  %v602_v20 = vld [vmem:[#allocation13 + $0x140] sm:$0xff]  ;;  %v597_v17 = vld [vmem:[#allocation13 + $0x118] sm:$0xff] }
 0x1b4   :  { %2301 = vmatmul.mubr.f32.vlgmr.msra.gmra.mrb[2].mxu0 %v277_v19  ;;  %v2267_v22 = vpop.f32.mrb[1].mxu1  ;;  %v599_v19 = vld [vmem:[#allocation13 + $0x128] sm:$0xff]  ;;  %v594_v15 = vld [vmem:[#allocation13 + $0x100] sm:$0xff] }
 0x1b5   :  { %691 = vmatprep.mubr.f32.mxu0 %v4314_v1  ;;  %2787 = vmatpush1.bf16.msra.mxu0 %v3860_v49  ;;  %4350 = vst [vmem:[#allocation34_spill] sm:$0xff] %v3890_v18  ;;  %v3893_v22 = vpack.c.bf16 %v602_v20, %v599_v19  ;;  %v3936_v19 = vpack.c.bf16 %v597_v17, %v594_v15  ;;  %v600_v20 = vld [vmem:[#allocation13 + $0x130] sm:$0xff]  ;;  %v780_v17 = vld [vmem:[#allocation14 + $0x60] sm:$0xff] }
 0x1b6   :  { %2789 = vmatprep.subr.bf16.mxu0 %v3863_v53  ;;  %v3940_v24 = vpack.c.bf16 %v603_v23, %v600_v20  ;;  %v3968_v15 = vpack.c.bf16 %v779_v6, %v776_v3  ;;  %v3972_v20 = vpack.c.bf16 %v784_v10, %v781_v7  ;;  %v783_v23 = vld [vmem:[#allocation14 + $0x78] sm:$0xff]  ;;  %v792_v3 = vld [vmem:[#allocation14 + $0xc0] sm:$0xff]  ;;  %v794_v10 = vld [vmem:[#allocation14 + $0xd0] sm:$0xff] }
 0x1b7   :  { %4351 = vst [vmem:[#allocation35_spill] sm:$0xff] %v3893_v22  ;;  %v795_v7 = vld [vmem:[#allocation14 + $0xd8] sm:$0xff] }
 0x1b9   :  { %2791 = vmatpush1.bf16.msra.mxu0 %v3866_v55 }
 0x1ba   :  { %2793 = vmatprep.subr.bf16.mxu0 %v3869_v58 }
 0x1bd   :  { %2795 = vmatpush1.bf16.msra.mxu0 %v3872_v61 }
 0x1be   :  { %2797 = vmatprep.subr.bf16.mxu0 %v3875_v2 }
 0x1c1   :  { %2799 = vmatpush1.bf16.msra.mxu0 %v3878_v5 }
 0x1c2   :  { %2801 = vmatprep.subr.bf16.mxu0 %v3881_v8 }
 0x1c5   :  { %2803 = vmatpush1.bf16.msra.mxu0 %v3884_v11 }
 0x1c6   :  { %2805 = vmatprep.subr.bf16.mxu0 %v3887_v14 }
 0x1c9   :  { %2807 = vmatpush1.bf16.msra.mxu0 %v3890_v18 }
 0x1ca   :  { %2809 = vmatprep.subr.bf16.mxu0 %v3893_v22 }
 0x1cd   :  { %2811 = vmatpush1.bf16.msra.mxu0 %v3896_v26 }
 0x1ce   :  { %2813 = vmatprep.subr.bf16.mxu0 %v3899_v30 }
 0x1d1   :  { %2815 = vmatpush1.bf16.msra.mxu0 %v3902_v35 }
 0x287   :  { %v449_v36 = vpop.f32.mrb[2].mxu0 }
 0x288   :  { %v450_v39 = vadd.f32 %v449_v36, %v3828_v21  ;;  %v2302_v41 = vpop.f32.mrb[3].mxu0  ;;  %v570_v21 = vld [vmem:[#allocation13 + $0x40] sm:$0xff] }
 0x289   :  { %v3918_v62 = vpack.c.bf16 %v573_v60, %v570_v21  ;;  %v772_v36 = vld [vmem:[#allocation14 + $0x20] sm:$0xff]  ;;  %v771_v41 = vld [vmem:[#allocation14 + $0x18] sm:$0xff] }
 0x28a   :  { %v460_v42 = vadd.f32 %v1957_v38, %v450_v39  ;;  %v3949_v38 = vpack.c.bf16 %v772_v36, %v769_v33  ;;  %v768_v39 = vld [vmem:[#allocation14] sm:$0xff]  ;;  %v787_v33 = vld [vmem:[#allocation14 + $0x98] sm:$0xff]  ;;  %v790_v36 = vld [vmem:[#allocation14 + $0xb0] sm:$0xff] }
 0x28b   :  { %v3957_v52 = vpack.c.bf16 %v771_v41, %v768_v39  ;;  %v3979_v39 = vpack.c.bf16 %v783_v23, %v780_v17  ;;  %v3981_v41 = vpack.c.bf16 %v785_v29, %v782_v27  ;;  %v797_v17 = vld [vmem:[#allocation14 + $0xe8] sm:$0xff]  ;;  %v799_v23 = vld [vmem:[#allocation14 + $0xf8] sm:$0xff]  ;;  %v802_v27 = vld [vmem:[#allocation14 + $0x110] sm:$0xff]  ;;  %v3999_v29 = vpack.c.bf16 %v795_v7, %v792_v3 }
 0x28c   :  { %3252 = vtanh.f32 %v460_v42  ;;  %4355 = vst [vmem:[#allocation39_spill] sm:$0xff] %v3949_v38  ;;  %2841 = vmatprep.subr.bf16.mxu0 %v3949_v38  ;;  %v770_v42 = vld [vmem:[#allocation14 + $0x10] sm:$0xff] }
 0x296   :  { %v3910_v44 = vpop.eup %3252 }
 0x297   :  { %v462_v45 = vrot.slane %v3910_v44, 4 }
 0x299   :  { %v463_v46 = vadd.f32 %v3910_v44, %v462_v45  ;;  %v773_v45 = vld [vmem:[#allocation14 + $0x28] sm:$0xff] }
 0x29a   :  { %v3959_v54 = vpack.c.bf16 %v773_v45, %v770_v42  ;;  %v786_v42 = vld [vmem:[#allocation14 + $0x90] sm:$0xff]  ;;  %v3985_v45 = vpack.c.bf16 %v790_v36, %v787_v33  ;;  %v4001_v33 = vpack.c.bf16 %v797_v17, %v794_v10  ;;  %v804_v10 = vld [vmem:[#allocation14 + $0x120] sm:$0xff] }
 0x29b   :  { %v464_v48 = vrot.slane %v463_v46, 2  ;;  %v798_v36 = vld [vmem:[#allocation14 + $0xf0] sm:$0xff] }
 0x29d   :  { %v465_v50 = vadd.f32 %v464_v48, %v463_v46  ;;  %v3955_v46 = vld [vmem:[%s4304_s8] ss:$0 sm:$0xff]  ;;  %v775_v48 = vld [vmem:[#allocation14 + $0x38] sm:$0xff] }
 0x29f   :  { %v466_v51 = vrot.slane %v465_v50, 1 }
 0x2a1   :  { %v467_v56 = vadd.f32 %v466_v51, %v465_v50  ;;  %v778_v50 = vld [vmem:[#allocation14 + $0x50] sm:$0xff] }
 0x2a2   :  { %v3962_v60 = vpack.c.bf16 %v778_v50, %v775_v48  ;;  %v789_v48 = vld [vmem:[#allocation14 + $0xa8] sm:$0xff]  ;;  %v788_v50 = vld [vmem:[#allocation14 + $0xa0] sm:$0xff] }
 0x2a3   :  { %v468_v59 = vsub.f32 %v467_v56, %v3910_v44  ;;  %v774_v56 = vld [vmem:[#allocation14 + $0x30] sm:$0xff] }
 0x2a4   :  { %v3966_v12 = vpack.c.bf16 %v777_v63, %v774_v56  ;;  %v793_v56 = vld [vmem:[#allocation14 + $0xc8] sm:$0xff] }
 0x2a5   :  { %2336 = vmatmul.mubr.f32.vlgmr.msra.gmra.mrb[2].mxu1 %v468_v59 }
 0x2a6   :  { %2818 = vmatpush3.bf16.msra.mxu1 %v3914_v57  ;;  %2370 = vmatprep.mubr.msk.f32.mxu1 %vm3555_vm0, %v4314_v1 }
 0x2a7   :  { %2819 = vmatprep.subr.bf16.mxu1 %v4325_v0 }
 0x2aa   :  { %2821 = vmatpush3.bf16.msra.mxu1 %v3918_v62 }
 0x2ab   :  { %2822 = vmatprep.subr.bf16.mxu1 %v4325_v0 }
 0x2ae   :  { %2824 = vmatpush3.bf16.msra.mxu1 %v3924_v4 }
 0x2af   :  { %2825 = vmatprep.subr.bf16.mxu1 %v4325_v0 }
 0x2b2   :  { %2827 = vmatpush3.bf16.msra.mxu1 %v3928_v9 }
 0x2b3   :  { %2828 = vmatprep.subr.bf16.mxu1 %v4325_v0 }
 0x2b6   :  { %2830 = vmatpush3.bf16.msra.mxu1 %v3932_v13 }
 0x2b7   :  { %2831 = vmatprep.subr.bf16.mxu1 %v4325_v0 }
 0x2ba   :  { %2833 = vmatpush3.bf16.msra.mxu1 %v3936_v19 }
 0x2bb   :  { %2834 = vmatprep.subr.bf16.mxu1 %v4325_v0 }
 0x2be   :  { %2836 = vmatpush3.bf16.msra.mxu1 %v3940_v24 }
 0x2bf   :  { %2837 = vmatprep.subr.bf16.mxu1 %v4325_v0 }
 0x2c2   :  { %2839 = vmatpush3.bf16.msra.mxu1 %v3944_v32 }
 0x2c3   :  { %2872 = vmatprep.subr.bf16.mxu1 %v4325_v0 }
 0x378   :  { %v558_v51 = vpop.f32.mrb[2].mxu1 }
 0x379   :  { %v559_v59 = vadd.f32 %v3955_v46, %v558_v51  ;;  %v2337_v21 = vpop.f32.mrb[3].mxu1  ;;  %v791_v51 = vld [vmem:[#allocation14 + $0xb8] sm:$0xff] }
 0x37a   :  { %v3989_v21 = vpack.c.bf16 %v789_v48, %v786_v42  ;;  %v3991_v63 = vpack.c.bf16 %v791_v51, %v788_v50  ;;  %v4005_v42 = vpack.c.bf16 %v802_v27, %v799_v23  ;;  %v801_v48 = vld [vmem:[#allocation14 + $0x108] sm:$0xff]  ;;  %v800_v50 = vld [vmem:[#allocation14 + $0x100] sm:$0xff]  ;;  %v803_v51 = vld [vmem:[#allocation14 + $0x118] sm:$0xff] }
 0x37b   :  { %692 = vmatmul.mubr.f32.vlgmr.msra.gmra.mrb[4].mxu0 %v559_v59  ;;  %2371 = vmatmul.mubr.f32.vlgmr.msra.gmra.mrb[4].mxu1 %v559_v59  ;;  %v796_v59 = vld [vmem:[#allocation14 + $0xe0] sm:$0xff]  ;;  %v4009_v3 = vpack.c.bf16 %v801_v48, %v798_v36  ;;  %v4011_v7 = vpack.c.bf16 %v803_v51, %v800_v50  ;;  %v807_v23 = vld [vmem:[#allocation14 + $0x138] sm:$0xff]  ;;  %v806_v27 = vld [vmem:[#allocation14 + $0x130] sm:$0xff] }
 0x37c   :  { %2843 = vmatpush1.bf16.msra.mxu0 %v3957_v52  ;;  %2874 = vmatpush3.bf16.msra.mxu1 %v3959_v54  ;;  %4356 = vst [vmem:[#allocation40_spill] sm:$0xff] %v3991_v63  ;;  %v3995_v6 = vpack.c.bf16 %v796_v59, %v793_v56  ;;  %4358 = vst [vmem:[#allocation42_spill] sm:$0xff] %v4005_v42  ;;  %v805_v56 = vld [vmem:[#allocation14 + $0x128] sm:$0xff]  ;;  %v808_v59 = vld [vmem:[#allocation14 + $0x140] sm:$0xff]  ;;  %v4019_v36 = vpack.c.bf16 %v807_v23, %v804_v10 }
 0x37d   :  { %2845 = vmatprep.subr.bf16.mxu0 %v3962_v60  ;;  %2875 = vmatprep.subr.bf16.mxu1 %v4325_v0  ;;  %4359 = vst [vmem:[#allocation43_spill] sm:$0xff] %v4009_v3  ;;  %v4015_v17 = vpack.c.bf16 %v808_v59, %v805_v56  ;;  %v810_v50 = vld [vmem:[#allocation14 + $0x150] sm:$0xff]  ;;  %v813_v56 = vld [vmem:[#allocation14 + $0x168] sm:$0xff]  ;;  %v812_v59 = vld [vmem:[#allocation14 + $0x160] sm:$0xff] }
 0x37e   :  { %897 = vmatprep.mubr.f32.mxu0 %v4314_v1  ;;  %2405 = vmatprep.mubr.msk.f32.mxu1 %vm3555_vm0, %v4314_v1  ;;  %4357 = vst [vmem:[#allocation41_spill] sm:$0xff] %v3995_v6  ;;  %v809_v1 = vld [vmem:[#allocation14 + $0x148] sm:$0xff] }
 0x37f   :  { %v4021_v48 = vpack.c.bf16 %v809_v1, %v806_v27  ;;  %v4360_v1 = vmov 0.0  }
 0x380   :  { %2847 = vmatpush1.bf16.msra.mxu0 %v3966_v12  ;;  %2877 = vmatpush3.bf16.msra.mxu1 %v3968_v15 }
 0x381   :  { %2849 = vmatprep.subr.bf16.mxu0 %v3972_v20  ;;  %2878 = vmatprep.subr.bf16.mxu1 %v4325_v0 }
 0x384   :  { %2851 = vmatpush1.bf16.msra.mxu0 %v3979_v39  ;;  %2880 = vmatpush3.bf16.msra.mxu1 %v3981_v41 }
 0x385   :  { %2853 = vmatprep.subr.bf16.mxu0 %v3985_v45  ;;  %2881 = vmatprep.subr.bf16.mxu1 %v4325_v0 }
 0x388   :  { %2855 = vmatpush1.bf16.msra.mxu0 %v3989_v21  ;;  %2883 = vmatpush3.bf16.msra.mxu1 %v3991_v63  ;;  %v814_v63 = vld [vmem:[#allocation14 + $0x170] sm:$0xff] }
 0x389   :  { %2857 = vmatprep.subr.bf16.mxu0 %v3995_v6  ;;  %2884 = vmatprep.subr.bf16.mxu1 %v4325_v0  ;;  %v811_v6 = vld [vmem:[#allocation14 + $0x158] sm:$0xff] }
 0x38a   :  { %v4025_v51 = vpack.c.bf16 %v814_v63, %v811_v6 }
 0x38c   :  { %2859 = vmatpush1.bf16.msra.mxu0 %v3999_v29  ;;  %2886 = vmatpush3.bf16.msra.mxu1 %v4001_v33 }
 0x38d   :  { %2861 = vmatprep.subr.bf16.mxu0 %v4005_v42  ;;  %2887 = vmatprep.subr.bf16.mxu1 %v4325_v0  ;;  %v815_v42 = vld [vmem:[#allocation14 + $0x178] sm:$0xff] }
 0x38e   :  { %v4031_v10 = vpack.c.bf16 %v815_v42, %v812_v59  ;;  %v612_v42 = vlaneseq  ;;  %v610_v59 = vld [vmem:[%s4307_s11] sm:$0x7] }
 0x390   :  { %2863 = vmatpush1.bf16.msra.mxu0 %v4009_v3  ;;  %2889 = vmatpush3.bf16.msra.mxu1 %v4011_v7  ;;  %v4029_v3 = vpack.c.bf16 %v813_v56, %v810_v50  ;;  %v613_v23 = vshrl.u32 %v612_v42, 7  ;;  %v816_v50 = vld [vmem:[%s4308_s12] sm:$0x7] }
 0x391   :  { %2865 = vmatprep.subr.bf16.mxu0 %v4015_v17  ;;  %2890 = vmatprep.subr.bf16.mxu1 %v4325_v0 }
 0x392   :  { %v614_v27 = vsub.s32 0, %v613_v23  ;;  %v618_v56 = vsub.s32 1, %v613_v23 }
 0x394   :  { %2867 = vmatpush1.bf16.msra.mxu0 %v4019_v36  ;;  %2892 = vmatpush3.bf16.msra.mxu1 %v4021_v48 }
 0x395   :  { %2869 = vmatprep.subr.bf16.mxu0 %v4025_v51  ;;  %2893 = vmatprep.subr.bf16.mxu1 %v4325_v0 }
 0x398   :  { %2871 = vmatpush1.bf16.msra.mxu0 %v4029_v3  ;;  %2895 = vmatpush3.bf16.msra.mxu1 %v4031_v10 }
 0x399   :  { %2896 = vmatprep.subr.bf16.mxu0 %v4325_v0  ;;  %2921 = vmatprep.subr.bf16.mxu1 %v3858_v47 }
 0x39b   :  { %898 = vmatmul.mubr.f32.vlgmr.msra.gmra.mrb[4].mxu0 %v3910_v44  ;;  %2406 = vmatmul.mubr.f32.vlgmr.msra.gmra.mrb[6].mxu1 %v3910_v44 }
 0x39c   :  { %2898 = vmatpush3.bf16.msra.mxu0 %v3820_v16  ;;  %2440 = vmatprep.mubr.msk.f32.mxu0 %vm3555_vm0, %v4360_v1 }
 0x39d   :  { %2899 = vmatprep.subr.bf16.mxu0 %v4325_v0  ;;  %2923 = vmatpush1.bf16.msra.mxu1 %v3860_v49 }
 0x39e   :  { %2925 = vmatprep.subr.bf16.mxu1 %v3863_v53  ;;  %1136 = vmatprep.mubr.f32.mxu1 %v4360_v1 }
 0x3a0   :  { %2901 = vmatpush3.bf16.msra.mxu0 %v3830_v25 }
 0x3a1   :  { %2902 = vmatprep.subr.bf16.mxu0 %v4325_v0  ;;  %2927 = vmatpush1.bf16.msra.mxu1 %v3866_v55 }
 0x3a2   :  { %2929 = vmatprep.subr.bf16.mxu1 %v3869_v58 }
 0x3a4   :  { %2904 = vmatpush3.bf16.msra.mxu0 %v3834_v28 }
 0x3a5   :  { %2905 = vmatprep.subr.bf16.mxu0 %v4325_v0  ;;  %2931 = vmatpush1.bf16.msra.mxu1 %v3872_v61 }
 0x3a6   :  { %2933 = vmatprep.subr.bf16.mxu1 %v3875_v2 }
 0x3a8   :  { %2907 = vmatpush3.bf16.msra.mxu0 %v3837_v31 }
 0x3a9   :  { %2908 = vmatprep.subr.bf16.mxu0 %v4325_v0  ;;  %2935 = vmatpush1.bf16.msra.mxu1 %v3878_v5 }
 0x3aa   :  { %2937 = vmatprep.subr.bf16.mxu1 %v3881_v8 }
 0x3ac   :  { %2910 = vmatpush3.bf16.msra.mxu0 %v3841_v34 }
 0x3ad   :  { %2911 = vmatprep.subr.bf16.mxu0 %v4325_v0  ;;  %2939 = vmatpush1.bf16.msra.mxu1 %v3884_v11 }
 0x3ae   :  { %2941 = vmatprep.subr.bf16.mxu1 %v3887_v14 }
 0x3b0   :  { %2913 = vmatpush3.bf16.msra.mxu0 %v3845_v37 }
 0x3b1   :  { %2914 = vmatprep.subr.bf16.mxu0 %v4325_v0  ;;  %2943 = vmatpush1.bf16.msra.mxu1 %v3890_v18 }
 0x3b2   :  { %2945 = vmatprep.subr.bf16.mxu1 %v3893_v22 }
 0x3b4   :  { %2916 = vmatpush3.bf16.msra.mxu0 %v3849_v40 }
 0x3b5   :  { %2917 = vmatprep.subr.bf16.mxu0 %v4325_v0  ;;  %2947 = vmatpush1.bf16.msra.mxu1 %v3896_v26 }
 0x3b6   :  { %2949 = vmatprep.subr.bf16.mxu1 %v3899_v30  ;;  %v619_v30 = vrot.slane %v610_v59, %v618_v56 }
 0x3b8   :  { %2919 = vmatpush3.bf16.msra.mxu0 %v3853_v43  ;;  %v615_v43 = vrot.slane %v610_v59, %v614_v27 }
 0x3b9   :  { %2952 = vmatprep.subr.bf16.mxu0 %v4325_v0  ;;  %2951 = vmatpush1.bf16.msra.mxu1 %v3902_v35  ;;  %v821_v0 = vrot.slane %v816_v50, %v614_v27  ;;  %v825_v35 = vrot.slane %v816_v50, %v618_v56 }
 0x3ba   :  { %2977 = vmatprep.subr.bf16.mxu1 %v3949_v38 }
 0x3bb   :  { %v4082_v26 = vadd.f32 %v821_v0, %v615_v43  ;;  %v4084_v38 = vadd.f32 %v825_v35, %v619_v30  ;;  %v622_v0 = vsub.s32 2, %v613_v23 }
 0x3bd   :  { %4361 = vst [vmem:[#allocation44_spill] sm:$0xff] %v4082_v26  ;;  %v4088_v30 = vrot.slane %v816_v50, %v622_v0  ;;  %v4090_v35 = vrot.slane %v610_v59, %v622_v0 }
 0x44e   :  { %v764_v63 = vpop.f32.mrb[4].mxu1 }
 0x44f   :  { %v2372_v6 = vpop.f32.mrb[5].mxu1 }
 0x46e   :  { %v899_v6 = vpop.f32.mrb[4].mxu0  ;;  %v970_v42 = vpop.f32.mrb[6].mxu1 }
 0x46f   :  { %v3217_v40 = vadd.f32 %v4082_v26, %v899_v6  ;;  %v901_v22 = vpop.f32.mrb[5].mxu0  ;;  %v2407_v18 = vpop.f32.mrb[7].mxu1 }
 0x470   :  { %v3219_v37 = vadd.f32 %v4084_v38, %v901_v22  ;;  %v971_v18 = vadd.f32 %v970_v42, %v4088_v30 }
 0x471   :  { %v975_v14 = vsub.f32 0.0, %v3217_v40  ;;  %v765_v40 = vadd.f32 %v764_v63, %v4090_v35 }
 0x472   :  { %v982_v34 = vsub.f32 0.0, %v3219_v37 }
 0x473   :  { %v976_v11 = vmul.f32 1.442695, %v975_v14 }
 0x474   :  { %v983_v8 = vmul.f32 1.442695, %v982_v34 }
 0x475   :  { %3254 = vpow2.f32 %v976_v11 }
 0x476   :  { %3256 = vpow2.f32 %v983_v8 }
 0x47f   :  { %v3255_v27 = vpop.eup %3254 }
 0x480   :  { %v978_v56 = vadd.f32 1.0, %v3255_v27  ;;  %v3257_v43 = vpop.eup %3256 }
 0x481   :  { %v985_v6 = vadd.f32 1.0, %v3257_v43  ;;  %v4362_v43 = vmov 0.0|0.0  }
 0x482   :  { %3258 = vrcp.f32 %v978_v56 }
 0x483   :  { %3260 = vrcp.f32 %v985_v6 }
 0x48c   :  { %v3259_v26 = vpop.eup %3258 }
 0x48d   :  { %v988_v14 = vmul.f32 %v3259_v26, %v971_v18  ;;  %v3261_v34 = vpop.eup %3260 }
 0x48e   :  { %v991_v8 = vsub.f32 1.0, %v3261_v34  ;;  %v993_v23 = vmul.f32 %v3261_v34, %v3910_v44  ;;  %v4365_v34 = vld [vmem:[#allocation42_spill] sm:$0xff] }
 0x48f   :  { %v989_v37 = vadd.f32 %v988_v14, %v765_v40  ;;  %v4363_v14 = vld [vmem:[#allocation40_spill] sm:$0xff] }
 0x491   :  { %3262 = vtanh.f32 %v989_v37  ;;  %v4364_v37 = vld [vmem:[#allocation41_spill] sm:$0xff] }
 0x49b   :  { %v3263_v11 = vpop.eup %3262 }
 0x49c   :  { %v992_v22 = vmul.f32 %v3263_v11, %v991_v8  ;;  %v4366_v8 = vld [vmem:[#allocation43_spill] sm:$0xff] }
 0x49d   :  { %v4379_v11 = vld [vmem:[#allocation39_spill] sm:$0xff] }
 0x49e   :  { %v4095_v50 = vadd.f32 %v993_v23, %v992_v22 }
 0x4a0   :  { %v995_v59 = vrot.slane %v4095_v50, 4 }
 0x4a2   :  { %v996_v27 = vadd.f32 %v995_v59, %v4095_v50 }
 0x4a4   :  { %v997_v42 = vrot.slane %v996_v27, 2 }
 0x4a6   :  { %v998_v56 = vadd.f32 %v997_v42, %v996_v27  ;;  %v4380_v42 = vld [vmem:[#allocation44_spill] sm:$0xff] }
 0x4a8   :  { %v999_v0 = vrot.slane %v998_v56, 1 }
 0x4aa   :  { %v1000_v63 = vadd.f32 %v999_v0, %v998_v56 }
 0x4ac   :  { %v1001_v26 = vsub.f32 %v1000_v63, %v4095_v50 }
 0x4ae   :  { %2441 = vmatmul.mubr.f32.vlgmr.msra.gmra.mrb[6].mxu0 %v1001_v26 }
 0x4af   :  { %2954 = vmatpush3.bf16.msra.mxu0 %v3914_v57  ;;  %2475 = vmatprep.mubr.msk.f32.mxu0 %vm3555_vm0, %v4360_v1 }
 0x4b0   :  { %2955 = vmatprep.subr.bf16.mxu0 %v4362_v43 }
 0x4b3   :  { %2957 = vmatpush3.bf16.msra.mxu0 %v3918_v62 }
 0x4b4   :  { %2958 = vmatprep.subr.bf16.mxu0 %v4362_v43 }
 0x4b7   :  { %2960 = vmatpush3.bf16.msra.mxu0 %v3924_v4 }
 0x4b8   :  { %2961 = vmatprep.subr.bf16.mxu0 %v4362_v43 }
 0x4bb   :  { %2963 = vmatpush3.bf16.msra.mxu0 %v3928_v9 }
 0x4bc   :  { %2964 = vmatprep.subr.bf16.mxu0 %v4362_v43 }
 0x4bf   :  { %2966 = vmatpush3.bf16.msra.mxu0 %v3932_v13 }
 0x4c0   :  { %2967 = vmatprep.subr.bf16.mxu0 %v4362_v43 }
 0x4c3   :  { %2969 = vmatpush3.bf16.msra.mxu0 %v3936_v19 }
 0x4c4   :  { %2970 = vmatprep.subr.bf16.mxu0 %v4362_v43 }
 0x4c7   :  { %2972 = vmatpush3.bf16.msra.mxu0 %v3940_v24 }
 0x4c8   :  { %2973 = vmatprep.subr.bf16.mxu0 %v4362_v43 }
 0x4cb   :  { %2975 = vmatpush3.bf16.msra.mxu0 %v3944_v32 }
 0x4cc   :  { %3008 = vmatprep.subr.bf16.mxu0 %v4362_v43 }
 0x581   :  { %v1068_v6 = vpop.f32.mrb[6].mxu0 }
 0x582   :  { %v1069_v18 = vadd.f32 %v3955_v46, %v1068_v6  ;;  %v2442_v40 = vpop.f32.mrb[7].mxu0 }
 0x584   :  { %1137 = vmatmul.mubr.f32.vlgmr.msra.gmra.mrb[8].mxu1 %v1069_v18  ;;  %2476 = vmatmul.mubr.f32.vlgmr.msra.gmra.mrb[8].mxu0 %v1069_v18 }
 0x585   :  { %2979 = vmatpush1.bf16.msra.mxu1 %v3957_v52  ;;  %3010 = vmatpush3.bf16.msra.mxu0 %v3959_v54 }
 0x586   :  { %2981 = vmatprep.subr.bf16.mxu1 %v3962_v60  ;;  %3011 = vmatprep.subr.bf16.mxu0 %v4362_v43 }
 0x587   :  { %1277 = vmatprep.mubr.f32.mxu1 %v4360_v1  ;;  %2510 = vmatprep.mubr.msk.f32.mxu0 %vm3555_vm0, %v4360_v1 }
 0x589   :  { %2983 = vmatpush1.bf16.msra.mxu1 %v3966_v12  ;;  %3013 = vmatpush3.bf16.msra.mxu0 %v3968_v15 }
 0x58a   :  { %2985 = vmatprep.subr.bf16.mxu1 %v3972_v20  ;;  %3014 = vmatprep.subr.bf16.mxu0 %v4362_v43 }
 0x58d   :  { %2987 = vmatpush1.bf16.msra.mxu1 %v3979_v39  ;;  %3016 = vmatpush3.bf16.msra.mxu0 %v3981_v41 }
 0x58e   :  { %2989 = vmatprep.subr.bf16.mxu1 %v3985_v45  ;;  %3017 = vmatprep.subr.bf16.mxu0 %v4362_v43 }
 0x591   :  { %2991 = vmatpush1.bf16.msra.mxu1 %v3989_v21  ;;  %3019 = vmatpush3.bf16.msra.mxu0 %v4363_v14 }
 0x592   :  { %2993 = vmatprep.subr.bf16.mxu1 %v4364_v37  ;;  %3020 = vmatprep.subr.bf16.mxu0 %v4362_v43 }
 0x595   :  { %2995 = vmatpush1.bf16.msra.mxu1 %v3999_v29  ;;  %3022 = vmatpush3.bf16.msra.mxu0 %v4001_v33 }
 0x596   :  { %2997 = vmatprep.subr.bf16.mxu1 %v4365_v34  ;;  %3023 = vmatprep.subr.bf16.mxu0 %v4362_v43 }
 0x599   :  { %2999 = vmatpush1.bf16.msra.mxu1 %v4366_v8  ;;  %3025 = vmatpush3.bf16.msra.mxu0 %v4011_v7 }
 0x59a   :  { %3001 = vmatprep.subr.bf16.mxu1 %v4015_v17  ;;  %3026 = vmatprep.subr.bf16.mxu0 %v4362_v43 }
 0x59d   :  { %3003 = vmatpush1.bf16.msra.mxu1 %v4019_v36  ;;  %3028 = vmatpush3.bf16.msra.mxu0 %v4021_v48 }
 0x59e   :  { %3005 = vmatprep.subr.bf16.mxu1 %v4025_v51  ;;  %3029 = vmatprep.subr.bf16.mxu0 %v4362_v43 }
 0x5a1   :  { %3007 = vmatpush1.bf16.msra.mxu1 %v4029_v3  ;;  %3031 = vmatpush3.bf16.msra.mxu0 %v4031_v10 }
 0x5a2   :  { %3032 = vmatprep.subr.bf16.mxu1 %v4362_v43  ;;  %3057 = vmatprep.subr.bf16.mxu0 %v3858_v47  ;;  %v4369_v47 = vld [vmem:[#allocation32_spill] sm:$0xff] }
 0x5a4   :  { %1278 = vmatmul.mubr.f32.vlgmr.msra.gmra.mrb[8].mxu1 %v4095_v50  ;;  %2511 = vmatmul.mubr.f32.vlgmr.msra.gmra.mrb[10].mxu0 %v4095_v50 }
 0x5a5   :  { %3034 = vmatpush3.bf16.msra.mxu1 %v3820_v16  ;;  %2545 = vmatprep.mubr.msk.f32.mxu1 %vm3555_vm0, %v4360_v1  ;;  %v4367_v16 = vld [vmem:[#allocation31_spill] sm:$0xff] }
 0x5a6   :  { %3035 = vmatprep.subr.bf16.mxu1 %v4362_v43  ;;  %3059 = vmatpush1.bf16.msra.mxu0 %v3860_v49  ;;  %v4371_v49 = vld [vmem:[#allocation28_spill] sm:$0xff] }
 0x5a7   :  { %3061 = vmatprep.subr.bf16.mxu0 %v3863_v53  ;;  %1516 = vmatprep.mubr.f32.mxu0 %v4360_v1  ;;  %v4372_v53 = vld [vmem:[#allocation34_spill] sm:$0xff] }
 0x5a9   :  { %3037 = vmatpush3.bf16.msra.mxu1 %v3830_v25  ;;  %v4368_v25 = vld [vmem:[#allocation27_spill] sm:$0xff] }
 0x5aa   :  { %3038 = vmatprep.subr.bf16.mxu1 %v4362_v43  ;;  %3063 = vmatpush1.bf16.msra.mxu0 %v3866_v55  ;;  %v4374_v55 = vld [vmem:[#allocation29_spill] sm:$0xff] }
 0x5ab   :  { %3065 = vmatprep.subr.bf16.mxu0 %v3869_v58  ;;  %v4375_v58 = vld [vmem:[#allocation36_spill] sm:$0xff] }
 0x5ad   :  { %3040 = vmatpush3.bf16.msra.mxu1 %v3834_v28  ;;  %v4370_v28 = vld [vmem:[#allocation33_spill] sm:$0xff] }
 0x5ae   :  { %3041 = vmatprep.subr.bf16.mxu1 %v4362_v43  ;;  %3067 = vmatpush1.bf16.msra.mxu0 %v3872_v61  ;;  %v4376_v61 = vld [vmem:[#allocation37_spill] sm:$0xff] }
 0x5af   :  { %3069 = vmatprep.subr.bf16.mxu0 %v3875_v2  ;;  %v4377_v2 = vld [vmem:[#allocation30_spill] sm:$0xff] }
 0x5b1   :  { %3043 = vmatpush3.bf16.msra.mxu1 %v3837_v31  ;;  %v4373_v31 = vld [vmem:[#allocation35_spill] sm:$0xff] }
 0x5b2   :  { %3044 = vmatprep.subr.bf16.mxu1 %v4362_v43  ;;  %3071 = vmatpush1.bf16.msra.mxu0 %v3878_v5  ;;  %v4378_v5 = vld [vmem:[#allocation38_spill] sm:$0xff] }
 0x5b3   :  { %3073 = vmatprep.subr.bf16.mxu0 %v4367_v16 }
 0x5b5   :  { %3046 = vmatpush3.bf16.msra.mxu1 %v4368_v25 }
 0x5b6   :  { %3047 = vmatprep.subr.bf16.mxu1 %v4362_v43  ;;  %3075 = vmatpush1.bf16.msra.mxu0 %v4369_v47 }
 0x5b7   :  { %3077 = vmatprep.subr.bf16.mxu0 %v4370_v28 }
 0x5b9   :  { %3049 = vmatpush3.bf16.msra.mxu1 %v4371_v49 }
 0x5ba   :  { %3050 = vmatprep.subr.bf16.mxu1 %v4362_v43  ;;  %3079 = vmatpush1.bf16.msra.mxu0 %v4372_v53 }
 0x5bb   :  { %3081 = vmatprep.subr.bf16.mxu0 %v4373_v31 }
 0x5bd   :  { %3052 = vmatpush3.bf16.msra.mxu1 %v4374_v55 }
 0x5be   :  { %3053 = vmatprep.subr.bf16.mxu1 %v4362_v43  ;;  %3083 = vmatpush1.bf16.msra.mxu0 %v4375_v58 }
 0x5bf   :  { %3085 = vmatprep.subr.bf16.mxu0 %v4376_v61 }
 0x5c1   :  { %3055 = vmatpush3.bf16.msra.mxu1 %v4377_v2 }
 0x5c2   :  { %3088 = vmatprep.subr.bf16.mxu1 %v4362_v43  ;;  %3087 = vmatpush1.bf16.msra.mxu0 %v4378_v5 }
 0x5c3   :  { %3113 = vmatprep.subr.bf16.mxu0 %v4379_v11 }
 0x657   :  { %v1209_v22 = vpop.f32.mrb[8].mxu0 }
 0x658   :  { %v2477_v23 = vpop.f32.mrb[9].mxu0  ;;  %v1210_v55 = vadd.f32 %v1209_v22, %v4090_v35 }
 0x677   :  { %v1279_v59 = vpop.f32.mrb[8].mxu1  ;;  %v1350_v27 = vpop.f32.mrb[10].mxu0 }
 0x678   :  { %v3221_v56 = vadd.f32 %v4380_v42, %v1279_v59  ;;  %v1281_v0 = vpop.f32.mrb[9].mxu1  ;;  %v2512_v63 = vpop.f32.mrb[11].mxu0  ;;  %v1351_v53 = vadd.f32 %v1350_v27, %v4088_v30 }
 0x679   :  { %v3223_v26 = vadd.f32 %v4084_v38, %v1281_v0 }
 0x67a   :  { %v1355_v6 = vsub.f32 0.0, %v3221_v56 }
 0x67b   :  { %v1362_v40 = vsub.f32 0.0, %v3223_v26 }
 0x67c   :  { %v1356_v18 = vmul.f32 1.442695, %v1355_v6 }
 0x67d   :  { %v1363_v16 = vmul.f32 1.442695, %v1362_v40  ;;  %v1776_v40 = vld [vmem:[#allocation17 + $0x28] sm:$0xff] }
 0x67e   :  { %3264 = vpow2.f32 %v1356_v18 }
 0x67f   :  { %3266 = vpow2.f32 %v1363_v16 }
 0x688   :  { %v3265_v25 = vpop.eup %3264 }
 0x689   :  { %v1358_v47 = vadd.f32 1.0, %v3265_v25  ;;  %v3267_v28 = vpop.eup %3266  ;;  %v1777_v25 = vld [vmem:[#allocation17 + $0x30] sm:$0xff] }
 0x68a   :  { %v1365_v49 = vadd.f32 1.0, %v3267_v28  ;;  %v1779_v28 = vld [vmem:[#allocation17 + $0x40] sm:$0xff] }
 0x68b   :  { %3268 = vrcp.f32 %v1358_v47 }
 0x68c   :  { %3270 = vrcp.f32 %v1365_v49  ;;  %v1780_v49 = vld [vmem:[#allocation17 + $0x48] sm:$0xff] }
 0x695   :  { %v3269_v31 = vpop.eup %3268 }
 0x696   :  { %v1368_v58 = vmul.f32 %v3269_v31, %v1351_v53  ;;  %v3271_v2 = vpop.eup %3270  ;;  %v3181_v53 = vpack.c.bf16 %v1780_v49, %v1779_v28  ;;  %v1781_v31 = vld [vmem:[#allocation17 + $0x50] sm:$0xff] }
 0x697   :  { %v1371_v5 = vsub.f32 1.0, %v3271_v2  ;;  %v1373_v59 = vmul.f32 %v3271_v2, %v4095_v50  ;;  %v1784_v2 = vld [vmem:[#allocation17 + $0x68] sm:$0xff] }
 0x698   :  { %v1369_v61 = vadd.f32 %v1368_v58, %v1210_v55  ;;  %v1782_v55 = vld [vmem:[#allocation17 + $0x58] sm:$0xff] }
 0x699   :  { %v3184_v58 = vpack.c.bf16 %v1782_v55, %v1781_v31 }
 0x69a   :  { %3272 = vtanh.f32 %v1369_v61  ;;  %v1783_v61 = vld [vmem:[#allocation17 + $0x60] sm:$0xff] }
 0x6a4   :  { %v3273_v11 = vpop.eup %3272 }
 0x6a5   :  { %v1372_v23 = vmul.f32 %v3273_v11, %v1371_v5  ;;  %v3187_v5 = vpack.c.bf16 %v1784_v2, %v1783_v61  ;;  %v1785_v11 = vld [vmem:[#allocation17 + $0x70] sm:$0xff] }
 0x6a7   :  { %v4196_v56 = vadd.f32 %v1373_v59, %v1372_v23  ;;  %v1786_v23 = vld [vmem:[#allocation17 + $0x78] sm:$0xff] }
 0x6a8   :  { %v3190_v59 = vpack.c.bf16 %v1786_v23, %v1785_v11 }
 0x6a9   :  { %v1375_v0 = vrot.slane %v4196_v56, 4 }
 0x6ab   :  { %v1376_v63 = vadd.f32 %v1375_v0, %v4196_v56 }
 0x6ad   :  { %v1377_v27 = vrot.slane %v1376_v63, 2 }
 0x6af   :  { %v1378_v26 = vadd.f32 %v1377_v27, %v1376_v63 }
 0x6b1   :  { %v1379_v6 = vrot.slane %v1378_v26, 1 }
 0x6b3   :  { %v1380_v22 = vadd.f32 %v1379_v6, %v1378_v26 }
 0x6b5   :  { %v1381_v18 = vsub.f32 %v1380_v22, %v4196_v56 }
 0x6b7   :  { %2546 = vmatmul.mubr.f32.vlgmr.msra.gmra.mrb[10].mxu1 %v1381_v18 }
 0x6b8   :  { %3090 = vmatpush3.bf16.msra.mxu1 %v3914_v57  ;;  %2580 = vmatprep.mubr.msk.f32.mxu1 %vm3555_vm0, %v4360_v1 }
 0x6b9   :  { %3091 = vmatprep.subr.bf16.mxu1 %v4362_v43 }
 0x6bc   :  { %3093 = vmatpush3.bf16.msra.mxu1 %v3918_v62 }
 0x6bd   :  { %3094 = vmatprep.subr.bf16.mxu1 %v4362_v43 }
 0x6c0   :  { %3096 = vmatpush3.bf16.msra.mxu1 %v3924_v4 }
 0x6c1   :  { %3097 = vmatprep.subr.bf16.mxu1 %v4362_v43 }
 0x6c4   :  { %3099 = vmatpush3.bf16.msra.mxu1 %v3928_v9  ;;  %v1755_v9 = vld [vmem:[#allocation16] sm:$0xff] }
 0x6c5   :  { %3100 = vmatprep.subr.bf16.mxu1 %v4362_v43 }
 0x6c8   :  { %3102 = vmatpush3.bf16.msra.mxu1 %v3932_v13  ;;  %v1756_v13 = vld [vmem:[#allocation16 + $0x8] sm:$0xff] }
 0x6c9   :  { %3103 = vmatprep.subr.bf16.mxu1 %v4362_v43 }
 0x6cc   :  { %3105 = vmatpush3.bf16.msra.mxu1 %v3936_v19  ;;  %v3193_v19 = vpack.c.bf16 %v1756_v13, %v1755_v9 }
 0x6cd   :  { %3106 = vmatprep.subr.bf16.mxu1 %v4362_v43 }
 0x6d0   :  { %3108 = vmatpush3.bf16.msra.mxu1 %v3940_v24  ;;  %v1757_v24 = vld [vmem:[#allocation16 + $0x10] sm:$0xff] }
 0x6d1   :  { %3109 = vmatprep.subr.bf16.mxu1 %v4362_v43 }
 0x6d4   :  { %3111 = vmatpush3.bf16.msra.mxu1 %v3944_v32  ;;  %v1758_v32 = vld [vmem:[#allocation16 + $0x18] sm:$0xff] }
 0x6d5   :  { %3144 = vmatprep.subr.bf16.mxu1 %v4362_v43 }
 0x78a   :  { %v1448_v57 = vpop.f32.mrb[10].mxu1 }
 0x78b   :  { %v1449_v62 = vadd.f32 %v3955_v46, %v1448_v57  ;;  %v2547_v4 = vpop.f32.mrb[11].mxu1  ;;  %v3196_v46 = vpack.c.bf16 %v1758_v32, %v1757_v24 }
 0x78d   :  { %1517 = vmatmul.mubr.f32.vlgmr.msra.gmra.mrb[12].mxu0 %v1449_v62  ;;  %2581 = vmatmul.mubr.f32.vlgmr.msra.gmra.mrb[12].mxu1 %v1449_v62 }
 0x78e   :  { %3115 = vmatpush1.bf16.msra.mxu0 %v3957_v52  ;;  %3146 = vmatpush3.bf16.msra.mxu1 %v3959_v54  ;;  %v1759_v52 = vld [vmem:[#allocation16 + $0x20] sm:$0xff]  ;;  %v1760_v54 = vld [vmem:[#allocation16 + $0x28] sm:$0xff] }
 0x78f   :  { %3117 = vmatprep.subr.bf16.mxu0 %v3962_v60  ;;  %3147 = vmatprep.subr.bf16.mxu1 %v4362_v43  ;;  %v3199_v60 = vpack.c.bf16 %v1760_v54, %v1759_v52 }
 0x790   :  { %1657 = vmatprep.mubr.f32.mxu0 %v4360_v1  ;;  %2615 = vmatprep.mubr.msk.f32.mxu1 %vm3555_vm0, %v4360_v1 }
 0x792   :  { %3119 = vmatpush1.bf16.msra.mxu0 %v3966_v12  ;;  %3149 = vmatpush3.bf16.msra.mxu1 %v3968_v15  ;;  %v1761_v12 = vld [vmem:[#allocation16 + $0x30] sm:$0xff]  ;;  %v1762_v15 = vld [vmem:[#allocation16 + $0x38] sm:$0xff] }
 0x793   :  { %3121 = vmatprep.subr.bf16.mxu0 %v3972_v20  ;;  %3150 = vmatprep.subr.bf16.mxu1 %v4362_v43  ;;  %v3202_v20 = vpack.c.bf16 %v1762_v15, %v1761_v12 }
 0x796   :  { %3123 = vmatpush1.bf16.msra.mxu0 %v3979_v39  ;;  %3152 = vmatpush3.bf16.msra.mxu1 %v3981_v41  ;;  %v1763_v39 = vld [vmem:[#allocation16 + $0x40] sm:$0xff]  ;;  %v1764_v41 = vld [vmem:[#allocation16 + $0x48] sm:$0xff] }
 0x797   :  { %3125 = vmatprep.subr.bf16.mxu0 %v3985_v45  ;;  %3153 = vmatprep.subr.bf16.mxu1 %v4362_v43  ;;  %v3205_v45 = vpack.c.bf16 %v1764_v41, %v1763_v39 }
 0x79a   :  { %3127 = vmatpush1.bf16.msra.mxu0 %v3989_v21  ;;  %3155 = vmatpush3.bf16.msra.mxu1 %v4363_v14  ;;  %v1765_v21 = vld [vmem:[#allocation16 + $0x50] sm:$0xff] }
 0x79b   :  { %3129 = vmatprep.subr.bf16.mxu0 %v4364_v37  ;;  %3156 = vmatprep.subr.bf16.mxu1 %v4362_v43  ;;  %v1773_v14 = vld [vmem:[#allocation17 + $0x10] sm:$0xff]  ;;  %v1774_v37 = vld [vmem:[#allocation17 + $0x18] sm:$0xff] }
 0x79e   :  { %3131 = vmatpush1.bf16.msra.mxu0 %v3999_v29  ;;  %3158 = vmatpush3.bf16.msra.mxu1 %v4001_v33  ;;  %v1766_v29 = vld [vmem:[#allocation16 + $0x58] sm:$0xff] }
 0x79f   :  { %3133 = vmatprep.subr.bf16.mxu0 %v4365_v34  ;;  %3159 = vmatprep.subr.bf16.mxu1 %v4362_v43  ;;  %v3208_v33 = vpack.c.bf16 %v1766_v29, %v1765_v21  ;;  %v3172_v34 = vpack.c.bf16 %v1774_v37, %v1773_v14 }
 0x7a2   :  { %3135 = vmatpush1.bf16.msra.mxu0 %v4366_v8  ;;  %3161 = vmatpush3.bf16.msra.mxu1 %v4011_v7  ;;  %v1768_v7 = vld [vmem:[#allocation16 + $0x68] sm:$0xff]  ;;  %v1775_v8 = vld [vmem:[#allocation17 + $0x20] sm:$0xff] }
 0x7a3   :  { %3137 = vmatprep.subr.bf16.mxu0 %v4015_v17  ;;  %3162 = vmatprep.subr.bf16.mxu1 %v4362_v43  ;;  %v3175_v16 = vpack.c.bf16 %v1776_v40, %v1775_v8 }
 0x7a6   :  { %3139 = vmatpush1.bf16.msra.mxu0 %v4019_v36  ;;  %3164 = vmatpush3.bf16.msra.mxu1 %v4021_v48  ;;  %v1769_v36 = vld [vmem:[#allocation16 + $0x70] sm:$0xff]  ;;  %v1770_v48 = vld [vmem:[#allocation16 + $0x78] sm:$0xff] }
 0x7a7   :  { %3141 = vmatprep.subr.bf16.mxu0 %v4025_v51  ;;  %3165 = vmatprep.subr.bf16.mxu1 %v4362_v43  ;;  %v3214_v51 = vpack.c.bf16 %v1770_v48, %v1769_v36 }
 0x7aa   :  { %3143 = vmatpush1.bf16.msra.mxu0 %v4029_v3  ;;  %3167 = vmatpush3.bf16.msra.mxu1 %v4031_v10  ;;  %v1767_v3 = vld [vmem:[#allocation16 + $0x60] sm:$0xff] }
 0x7ab   :  { %3192 = vmatprep.subr.bf16.mxu1 %v4362_v43  ;;  %3168 = vmatprep.subr.bf16.mxu0 %v4362_v43  ;;  %v3211_v17 = vpack.c.bf16 %v1768_v7, %v1767_v3  ;;  %v1771_v10 = vld [vmem:[#allocation17] sm:$0xff] }
 0x7ad   :  { %1658 = vmatmul.mubr.f32.vlgmr.msra.gmra.mrb[12].mxu0 %v4196_v56  ;;  %2616 = vmatmul.mubr.f32.vlgmr.msra.gmra.mrb[14].mxu1 %v4196_v56 }
 0x7ae   :  { %3194 = vmatpush3.bf16.msra.mxu1 %v3193_v19  ;;  %2685 = vmatprep.mubr.msk.f32.mxu1 %vm3555_vm0, %v4360_v1 }
 0x7af   :  { %3195 = vmatprep.subr.bf16.mxu1 %v4362_v43  ;;  %2650 = vmatprep.mubr.msk.f32.mxu0 %vm3555_vm0, %v4360_v1  ;;  %v1772_v1 = vld [vmem:[#allocation17 + $0x8] sm:$0xff] }
 0x7b0   :  { %v3169_v50 = vpack.c.bf16 %v1772_v1, %v1771_v10 }
 0x7b2   :  { %3197 = vmatpush3.bf16.msra.mxu1 %v3196_v46  ;;  %3170 = vmatpush3.bf16.msra.mxu0 %v3169_v50 }
 0x7b3   :  { %3198 = vmatprep.subr.bf16.mxu1 %v4362_v43  ;;  %3171 = vmatprep.subr.bf16.mxu0 %v4362_v43 }
 0x7b6   :  { %3200 = vmatpush3.bf16.msra.mxu1 %v3199_v60  ;;  %3173 = vmatpush3.bf16.msra.mxu0 %v3172_v34 }
 0x7b7   :  { %3201 = vmatprep.subr.bf16.mxu1 %v4362_v43  ;;  %3174 = vmatprep.subr.bf16.mxu0 %v4362_v43 }
 0x7ba   :  { %3203 = vmatpush3.bf16.msra.mxu1 %v3202_v20  ;;  %3176 = vmatpush3.bf16.msra.mxu0 %v3175_v16 }
 0x7bb   :  { %3204 = vmatprep.subr.bf16.mxu1 %v4362_v43  ;;  %3177 = vmatprep.subr.bf16.mxu0 %v4362_v43 }
 0x7be   :  { %3206 = vmatpush3.bf16.msra.mxu1 %v3205_v45 }
 0x7bf   :  { %3207 = vmatprep.subr.bf16.mxu1 %v4362_v43 }
 0x7c2   :  { %3209 = vmatpush3.bf16.msra.mxu1 %v3208_v33 }
 0x7c3   :  { %3210 = vmatprep.subr.bf16.mxu1 %v4362_v43 }
 0x7c6   :  { %3212 = vmatpush3.bf16.msra.mxu1 %v3211_v17 }
 0x7c7   :  { %3213 = vmatprep.subr.bf16.mxu1 %v4362_v43 }
 0x7ca   :  { %3215 = vmatpush3.bf16.msra.mxu1 %v3214_v51 }
 0x7cd   :  { %2686 = vmatmul.mubr.f32.vlgmr.msra.gmra.mrb[16].mxu1 %v3910_v44  ;;  %v1778_v44 = vld [vmem:[#allocation17 + $0x38] sm:$0xff] }
 0x7ce   :  { %v3178_v47 = vpack.c.bf16 %v1778_v44, %v1777_v25 }
 0x7d0   :  { %3179 = vmatpush3.bf16.msra.mxu0 %v3178_v47 }
 0x7d1   :  { %3180 = vmatprep.subr.bf16.mxu0 %v4362_v43 }
 0x7d4   :  { %3182 = vmatpush3.bf16.msra.mxu0 %v3181_v53 }
 0x7d5   :  { %3183 = vmatprep.subr.bf16.mxu0 %v4362_v43 }
 0x7d8   :  { %3185 = vmatpush3.bf16.msra.mxu0 %v3184_v58 }
 0x7d9   :  { %3186 = vmatprep.subr.bf16.mxu0 %v4362_v43 }
 0x7dc   :  { %3188 = vmatpush3.bf16.msra.mxu0 %v3187_v5 }
 0x7dd   :  { %3189 = vmatprep.subr.bf16.mxu0 %v4362_v43 }
 0x7e0   :  { %3191 = vmatpush3.bf16.msra.mxu0 %v3190_v59 }
 0x860   :  { %v1589_v0 = vpop.f32.mrb[12].mxu1 }
 0x861   :  { %v2582_v63 = vpop.f32.mrb[13].mxu1 }
 0x880   :  { %v1659_v27 = vpop.f32.mrb[12].mxu0  ;;  %v1730_v26 = vpop.f32.mrb[14].mxu1 }
 0x881   :  { %v3225_v6 = vadd.f32 %v4380_v42, %v1659_v27  ;;  %v1661_v22 = vpop.f32.mrb[13].mxu0  ;;  %v2617_v18 = vpop.f32.mrb[15].mxu1  ;;  %v1731_v46 = vadd.f32 %v1730_v26, %v4088_v30  ;;  %v1590_v42 = vadd.f32 %v1589_v0, %v4090_v35  ;;  %v1959_v30 = vld [vmem:[%s4311_s15] ss:$0 sm:$0xff] }
 0x882   :  { %v3227_v57 = vadd.f32 %v4084_v38, %v1661_v22 }
 0x883   :  { %v1735_v62 = vsub.f32 0.0, %v3225_v6 }
 0x884   :  { %v1742_v9 = vsub.f32 0.0, %v3227_v57 }
 0x885   :  { %v1736_v4 = vmul.f32 1.442695, %v1735_v62 }
 0x886   :  { %v1743_v13 = vmul.f32 1.442695, %v1742_v9 }
 0x887   :  { %3274 = vpow2.f32 %v1736_v4 }
 0x888   :  { %3276 = vpow2.f32 %v1743_v13 }
 0x891   :  { %v3275_v19 = vpop.eup %3274 }
 0x892   :  { %v1738_v24 = vadd.f32 1.0, %v3275_v19  ;;  %v3277_v43 = vpop.eup %3276 }
 0x893   :  { %v1745_v32 = vadd.f32 1.0, %v3277_v43 }
 0x894   :  { %3278 = vrcp.f32 %v1738_v24 }
 0x895   :  { %3280 = vrcp.f32 %v1745_v32 }
 0x89e   :  { %v3279_v52 = vpop.eup %3278 }
 0x89f   :  { %v1748_v54 = vmul.f32 %v3279_v52, %v1731_v46  ;;  %v3281_v15 = vpop.eup %3280 }
 0x8a0   :  { %v1923_v60 = vpop.f32.mrb[16].mxu1  ;;  %v1751_v20 = vsub.f32 1.0, %v3281_v15  ;;  %v1753_v45 = vmul.f32 %v3281_v15, %v4196_v56 }
 0x8a1   :  { %v1749_v38 = vadd.f32 %v1748_v54, %v1590_v42  ;;  %v2687_v12 = vpop.f32.mrb[17].mxu1 }
 0x8a3   :  { %3282 = vtanh.f32 %v1749_v38 }
 0x8ad   :  { %v3283_v39 = vpop.eup %3282 }
 0x8ae   :  { %v1752_v41 = vmul.f32 %v3283_v39, %v1751_v20 }
 0x8b0   :  { %v1754_v21 = vadd.f32 %v1753_v45, %v1752_v41 }
 0x8b2   :  { %2651 = vmatmul.mubr.f32.vlgmr.msra.gmra.mrb[14].mxu0 %v1754_v21 }
 0x985   :  { %v1853_v29 = vpop.f32.mrb[14].mxu0 }
 0x986   :  { %v1924_v35 = vadd.f32 %v1923_v60, %v1853_v29  ;;  %v2652_v33 = vpop.f32.mrb[15].mxu0 }
 0x988   :  { %v1934_v3 = vadd.f32 %v1959_v30, %v1924_v35 }
 0x98a   :  { %1935 = vst [vmem:[#allocation19] sm:$0xff] %v1934_v3 }
 0x98b   :  { %3515 = shalt.err (!%p3512_p0)
}
 0x98c   :  { %s3516_s28 = scalar_lea.hbm %s4312_s16, 128 }
 0x98d   :  { %p3517_p1 = scmp.ne.s32.totalorder %s4312_s16, %s3516_s28  ;;  %p3520_p2 = scmp.lt.u32.totalorder %s3516_s28, %s4312_s16 }
 0x98f   :  { %p3522_p3 = pnand %p3520_p2, %p3517_p1 }
 0x991   :  { %3525 = shalt.err (!%p3522_p3)
}
 0x992   :  { %1945 = dma.vmem_to_hbm [thread:$0]  %s1943_s1, 128, %s4312_s16, [#allocation4]  }
 0x993   :  { %3538 = dma.done.wait [#allocation4], 128  }
 0x994   :  { %3539 = vsyncadd [#allocation4], 4294967168 }
 0x995   :  { %1949 = vsyncpa [#allocation3], 1 }
 0x996   :  { %1950 = vsyncpa [#allocation6], 1 }
 0x997   :  { %1951 = vsyncpa [#allocation9], 1 }
 0x998   :  { %1952 = vsyncpa [#allocation12], 1 }
 0x999   :  { %1953 = vsyncpa [#allocation15], 1 }
 0x99a   :  { %1954 = vsyncpa [#allocation18], 1 }
 0x99b   :  { %1955 = vsyncpa [#allocation4], 1 }

</bundles_post_ra>
